<compile_context>
chip_gen: v5e
topology: v5e:2x2
jax: 0.10.0
libtpu: 0.0.40
codegen_flags: <defaults>
</compile_context>

<pallas_src>
import functools

import jax
import jax.numpy as jnp
from jax.experimental import pallas as pl
from jax.experimental.pallas import tpu as pltpu


def _transformer_block_kernel(
    x_ref,                                   # (BB, S, D) f32 activations
    wq_ref, wk_ref, wv_ref,                  # (D, D)  bf16, pre-transposed
    bq_ref, bk_ref, bv_ref,                  # (1, D)  f32
    wo_ref, bo_ref,                          # (D, D)  bf16, (1, D) f32
    g1_ref, be1_ref,                         # (1, D)  f32   norm1 gamma/beta
    w1_ref, b1_ref,                          # (D, F)  bf16, (1, F) f32
    w2_ref, b2_ref,                          # (F, D)  bf16, (1, D) f32
    g2_ref, be2_ref,                         # (1, D)  f32   norm2 gamma/beta
    o_ref,                                   # (BB, S, D) output
    attn_sc,                                 # (BB*S, D) bf16 scratch (head concat)
    *, num_heads, eps, ff_chunk):
  f32 = jnp.float32
  bf16 = jnp.bfloat16
  BB, S, D = x_ref.shape
  R = BB * S
  hd = D // num_heads
  scale = 1.0 / float(hd) ** 0.5

  # Residual path stays f32; bf16 copy feeds the MXU.
  x = x_ref[...].astype(f32).reshape(R, D)
  xb = x.astype(bf16)

  # QKV projections: tall (R, D) @ (D, D) bf16 matmuls, f32 accumulation.
  q = (jnp.dot(xb, wq_ref[...], preferred_element_type=f32) + bq_ref[0]) * scale
  k = jnp.dot(xb, wk_ref[...], preferred_element_type=f32) + bk_ref[0]
  v = jnp.dot(xb, wv_ref[...], preferred_element_type=f32) + bv_ref[0]
  qb, kb, vb = q.astype(bf16), k.astype(bf16), v.astype(bf16)

  # Per-(batch-row, head) attention; each head's output is written into the
  # (R, D) scratch at its lane offset so a single full-K out-proj matmul can
  # follow the loop.  (Lane slices are 128-aligned for real head dims; at the
  # tiny test hd they are merely correct.)
  for b in range(BB):
    r0 = b * S
    for h in range(num_heads):
      lo = h * hd
      qh = qb[r0:r0 + S, lo:lo + hd]
      kh = kb[r0:r0 + S, lo:lo + hd]
      vh = vb[r0:r0 + S, lo:lo + hd]
      s = jax.lax.dot_general(qh, kh, (((1,), (1,)), ((), ())),
                              preferred_element_type=f32)        # (S, S) = qh @ kh.T
      s = s - jnp.max(s, axis=-1, keepdims=True)
      p = jnp.exp(s)                                             # f32 (EUP)
      p = p * pl.reciprocal(jnp.sum(p, axis=-1, keepdims=True), approx=True)
      oh = jnp.dot(p.astype(bf16), vh, preferred_element_type=f32)  # (S, hd)
      attn_sc[r0:r0 + S, lo:lo + hd] = oh.astype(bf16)

  # Single full-K output projection over all heads / all rows.
  attn = jnp.dot(attn_sc[...], wo_ref[...], preferred_element_type=f32) + bo_ref[0]

  def layer_norm(y, g, b):
    mu = jnp.mean(y, axis=-1, keepdims=True)
    yc = y - mu
    var = jnp.mean(yc * yc, axis=-1, keepdims=True)
    return yc * jax.lax.rsqrt(var + eps) * g + b

  # Residual + norm1 (f32).
  x1 = layer_norm(x + attn, g1_ref[0], be1_ref[0])
  x1b = x1.astype(bf16)

  # Feed-forward tiled over the hidden dim F: never materializes (R, F).
  F = w1_ref.shape[1]
  ff = jnp.zeros((R, D), f32)
  for f0 in range(0, F, ff_chunk):
    fc = min(ff_chunk, F - f0)
    h1 = jnp.dot(x1b, w1_ref[:, f0:f0 + fc],
                 preferred_element_type=f32) + b1_ref[0, f0:f0 + fc]
    h1 = jnp.maximum(h1, 0.0).astype(bf16)
    ff = ff + jnp.dot(h1, w2_ref[f0:f0 + fc, :], preferred_element_type=f32)
  ff = ff + b2_ref[0]

  # Residual + norm2.
  x2 = layer_norm(x1 + ff, g2_ref[0], be2_ref[0])
  # TODO(synk): for D < 128 the output store is lane-masked; a wrapper-side
  # lane-dense reshape would help, but real model D is a 128-multiple.
  o_ref[...] = x2.reshape(BB, S, D).astype(o_ref.dtype)


def transformer_block(x, params, num_heads, eps=1e-6, *,
                      batch_block=None, ff_chunk=512):
  """Fused TransformerBlock forward. x: (B, S, D) float32."""
  (w_in, b_in, w_o, b_o, g1, be1, w1, b1, w2, b2, g2, be2) = params
  B, S, D = x.shape
  F = w1.shape[0]
  assert D % num_heads == 0

  f32, bf16 = jnp.float32, jnp.bfloat16

  # Block several batch rows per grid step so each matmul sees ~256 rows
  # (MXU height on v6e/v7x) when S is small; for real S (>=256) this stays 1
  # and the batch axis is split across cores.
  if batch_block is None:
    batch_block = min(B, max(1, 256 // max(S, 1)))
  while B % batch_block:
    batch_block -= 1
  ff_chunk = min(ff_chunk, F)

  # One-time wrapper-side split / transpose / cast: bf16 weights feed the MXU
  # at native rate and halve resident VMEM; biases & LN params stay f32.
  wq_t = w_in[:D, :].T.astype(bf16)            # (D, D)
  wk_t = w_in[D:2 * D, :].T.astype(bf16)       # (D, D)
  wv_t = w_in[2 * D:, :].T.astype(bf16)        # (D, D)
  bq = b_in[:D].reshape(1, D).astype(f32)
  bk = b_in[D:2 * D].reshape(1, D).astype(f32)
  bv = b_in[2 * D:].reshape(1, D).astype(f32)
  wo_t = w_o.T.astype(bf16)                    # (D, D)
  bo = b_o.reshape(1, D).astype(f32)
  w1_t = w1.T.astype(bf16)                     # (D, F)
  b1r = b1.reshape(1, F).astype(f32)
  w2_t = w2.T.astype(bf16)                     # (F, D)
  b2r = b2.reshape(1, D).astype(f32)
  g1r = g1.reshape(1, D).astype(f32)
  be1r = be1.reshape(1, D).astype(f32)
  g2r = g2.reshape(1, D).astype(f32)
  be2r = be2.reshape(1, D).astype(f32)

  weights = (wq_t, wk_t, wv_t, bq, bk, bv, wo_t, bo,
             g1r, be1r, w1_t, b1r, w2_t, b2r, g2r, be2r)

  def full_spec(a):
    nd = a.ndim
    return pl.BlockSpec(a.shape, lambda i, _nd=nd: (0,) * _nd)

  kernel = functools.partial(_transformer_block_kernel,
                             num_heads=num_heads, eps=float(eps),
                             ff_chunk=ff_chunk)

  # Explicit VMEM budget: resident bf16 weights (x2 for potential double
  # buffering) + double-buffered activation slabs + live intermediates.
  def nbytes(a):
    return int(a.size) * a.dtype.itemsize
  slab = batch_block * S * D * 4
  resident_w = 2 * sum(nbytes(w) for w in weights)
  live = 8 * slab + batch_block * S * max(S, ff_chunk) * 4
  vmem_limit = int(1.5 * (resident_w + 4 * slab + live))
  vmem_limit = min(max(vmem_limit, 16 * 2**20), 100 * 2**20)

  flops = B * S * (8 * D * D + 4 * D * F) + 4 * B * S * S * D
  cost = pl.CostEstimate(
      flops=flops,
      transcendentals=B * num_heads * S * S,
      bytes_accessed=2 * B * S * D * 4 + sum(nbytes(w) for w in weights))

  return pl.pallas_call(
      kernel,
      out_shape=jax.ShapeDtypeStruct((B, S, D), x.dtype),
      grid_spec=pltpu.PrefetchScalarGridSpec(
          num_scalar_prefetch=0,
          grid=(B // batch_block,),
          in_specs=[pl.BlockSpec((batch_block, S, D), lambda i: (i, 0, 0))]
                   + [full_spec(w) for w in weights],
          out_specs=pl.BlockSpec((batch_block, S, D), lambda i: (i, 0, 0)),
          scratch_shapes=[pltpu.VMEM((batch_block * S, D), bf16)],
      ),
      compiler_params=pltpu.CompilerParams(
          dimension_semantics=("parallel",),       # batch axis: megacore on v7x
          vmem_limit_bytes=vmem_limit),
      cost_estimate=cost,
  )(x, *weights)


def transformer_block_ref(x, params, num_heads, eps=1e-6):
  """Pure-JAX f32 reference matching PyTorch TransformerBlock (eval mode)."""
  (w_in, b_in, w_o, b_o, g1, be1, w1, b1, w2, b2, g2, be2) = params
  B, S, D = x.shape
  H = num_heads
  hd = D // H

  qkv = x @ w_in.T + b_in                                   # (B, S, 3D)
  q, k, v = qkv[..., :D], qkv[..., D:2 * D], qkv[..., 2 * D:]
  q = q.reshape(B, S, H, hd)
  k = k.reshape(B, S, H, hd)
  v = v.reshape(B, S, H, hd)
  s = jnp.einsum("bqhd,bkhd->bhqk", q, k) / jnp.sqrt(jnp.float32(hd))
  p = jax.nn.softmax(s, axis=-1)
  o = jnp.einsum("bhqk,bkhd->bqhd", p, v).reshape(B, S, D)
  attn_out = o @ w_o.T + b_o

  def ln(y, g, b):
    mu = jnp.mean(y, axis=-1, keepdims=True)
    var = jnp.mean((y - mu) ** 2, axis=-1, keepdims=True)
    return (y - mu) / jnp.sqrt(var + eps) * g + b

  x1 = ln(x + attn_out, g1, be1)
  ff = jnp.maximum(x1 @ w1.T + b1, 0.0) @ w2.T + b2
  x2 = ln(x1 + ff, g2, be2)
  return x2


if __name__ == "__main__":
  # Small shapes: batch=2, seq=8, d_model=32, heads=4, d_ff=64.
  B, S, D, H, F = 2, 8, 32, 4, 64
  key = jax.random.PRNGKey(0)
  keys = jax.random.split(key, 16)

  x = jax.random.normal(keys[0], (B, S, D), dtype=jnp.float32)

  def rnd(k, shape, scale=0.1):
    return scale * jax.random.normal(k, shape, dtype=jnp.float32)

  params = (
      rnd(keys[1], (3 * D, D)),          # in_proj_weight  (packed q,k,v)
      rnd(keys[2], (3 * D,)),            # in_proj_bias
      rnd(keys[3], (D, D)),              # out_proj.weight
      rnd(keys[4], (D,)),                # out_proj.bias
      1.0 + rnd(keys[5], (D,)),          # norm1.weight
      rnd(keys[6], (D,)),                # norm1.bias
      rnd(keys[7], (F, D)),              # ff linear1.weight
      rnd(keys[8], (F,)),                # ff linear1.bias
      rnd(keys[9], (D, F)),              # ff linear2.weight
      rnd(keys[10], (D,)),               # ff linear2.bias
      1.0 + rnd(keys[11], (D,)),         # norm2.weight
      rnd(keys[12], (D,)),               # norm2.bias
  )

  out = transformer_block(x, params, num_heads=H)
  out = jax.block_until_ready(out)

  ref = transformer_block_ref(x, params, num_heads=H)
  assert out.shape == (B, S, D)
  # bf16 MXU inputs with f32 accumulation -> compare against f32 reference with
  # a bf16-appropriate tolerance.
  assert jnp.allclose(out, ref, rtol=5e-2, atol=5e-2), (
      float(jnp.max(jnp.abs(out - ref))))

  print("KERNEL_OK")
</pallas_src>

<mosaic_0001>
module attributes {stable_mosaic.version = 11 : i64} {
  func.func @_transformer_block_kernel(%arg0: i32, %arg1: memref<2x8x32xf32, #tpu.memory_space<vmem>>, %arg2: memref<32x32xbf16, #tpu.memory_space<vmem>>, %arg3: memref<32x32xbf16, #tpu.memory_space<vmem>>, %arg4: memref<32x32xbf16, #tpu.memory_space<vmem>>, %arg5: memref<1x32xf32, #tpu.memory_space<vmem>>, %arg6: memref<1x32xf32, #tpu.memory_space<vmem>>, %arg7: memref<1x32xf32, #tpu.memory_space<vmem>>, %arg8: memref<32x32xbf16, #tpu.memory_space<vmem>>, %arg9: memref<1x32xf32, #tpu.memory_space<vmem>>, %arg10: memref<1x32xf32, #tpu.memory_space<vmem>>, %arg11: memref<1x32xf32, #tpu.memory_space<vmem>>, %arg12: memref<32x64xbf16, #tpu.memory_space<vmem>>, %arg13: memref<1x64xf32, #tpu.memory_space<vmem>>, %arg14: memref<64x32xbf16, #tpu.memory_space<vmem>>, %arg15: memref<1x32xf32, #tpu.memory_space<vmem>>, %arg16: memref<1x32xf32, #tpu.memory_space<vmem>>, %arg17: memref<1x32xf32, #tpu.memory_space<vmem>>, %arg18: memref<2x8x32xf32, #tpu.memory_space<vmem>>, %arg19: memref<16x32xbf16, #tpu.memory_space<vmem>>) attributes {dimension_semantics = [#tpu.dimension_semantics<parallel>], iteration_bounds = array<i64: 1>, scalar_prefetch = 0 : i64, scratch_operands = 1 : i64, tpu.core_type = #tpu.core_type<tc>, window_params = [{transform_indices = @transform_0, window_bounds = array<i64: 2, 8, 32>}, {pipeline_mode = #tpu.pipeline_mode<synchronous>, transform_indices = @transform_1, window_bounds = array<i64: 32, 32>}, {pipeline_mode = #tpu.pipeline_mode<synchronous>, transform_indices = @transform_2, window_bounds = array<i64: 32, 32>}, {pipeline_mode = #tpu.pipeline_mode<synchronous>, transform_indices = @transform_3, window_bounds = array<i64: 32, 32>}, {pipeline_mode = #tpu.pipeline_mode<synchronous>, transform_indices = @transform_4, window_bounds = array<i64: 1, 32>}, {pipeline_mode = #tpu.pipeline_mode<synchronous>, transform_indices = @transform_5, window_bounds = array<i64: 1, 32>}, {pipeline_mode = #tpu.pipeline_mode<synchronous>, transform_indices = @transform_6, window_bounds = array<i64: 1, 32>}, {pipeline_mode = #tpu.pipeline_mode<synchronous>, transform_indices = @transform_7, window_bounds = array<i64: 32, 32>}, {pipeline_mode = #tpu.pipeline_mode<synchronous>, transform_indices = @transform_8, window_bounds = array<i64: 1, 32>}, {pipeline_mode = #tpu.pipeline_mode<synchronous>, transform_indices = @transform_9, window_bounds = array<i64: 1, 32>}, {pipeline_mode = #tpu.pipeline_mode<synchronous>, transform_indices = @transform_10, window_bounds = array<i64: 1, 32>}, {pipeline_mode = #tpu.pipeline_mode<synchronous>, transform_indices = @transform_11, window_bounds = array<i64: 32, 64>}, {pipeline_mode = #tpu.pipeline_mode<synchronous>, transform_indices = @transform_12, window_bounds = array<i64: 1, 64>}, {pipeline_mode = #tpu.pipeline_mode<synchronous>, transform_indices = @transform_13, window_bounds = array<i64: 64, 32>}, {pipeline_mode = #tpu.pipeline_mode<synchronous>, transform_indices = @transform_14, window_bounds = array<i64: 1, 32>}, {pipeline_mode = #tpu.pipeline_mode<synchronous>, transform_indices = @transform_15, window_bounds = array<i64: 1, 32>}, {pipeline_mode = #tpu.pipeline_mode<synchronous>, transform_indices = @transform_16, window_bounds = array<i64: 1, 32>}, {transform_indices = @transform_17, window_bounds = array<i64: 2, 8, 32>}]} {
    %c0 = arith.constant 0 : index
    %c0_0 = arith.constant 0 : index
    %c0_1 = arith.constant 0 : index
    %0 = vector.load %arg1[%c0, %c0_0, %c0_1] : memref<2x8x32xf32, #tpu.memory_space<vmem>>, vector<2x8x32xf32>
    %1 = vector.shape_cast %0 : vector<2x8x32xf32> to vector<16x32xf32>
    %2 = arith.truncf %1 : vector<16x32xf32> to vector<16x32xbf16>
    %c0_2 = arith.constant 0 : index
    %c0_3 = arith.constant 0 : index
    %3 = vector.load %arg2[%c0_2, %c0_3] : memref<32x32xbf16, #tpu.memory_space<vmem>>, vector<32x32xbf16>
    %cst = arith.constant dense<0.000000e+00> : vector<16x32xf32>
    %4 = tpu.matmul %2, %3, %cst {dimension_numbers = #tpu.dot_dimension_numbers<[1], [0], [0], [1], [0, 0, 1, 1], [], []>} : vector<16x32xbf16>, vector<32x32xbf16>, vector<16x32xf32> -> vector<16x32xf32>
    %c0_4 = arith.constant 0 : index
    %c0_5 = arith.constant 0 : index
    %5 = vector.load %arg5[%c0_4, %c0_5] : memref<1x32xf32, #tpu.memory_space<vmem>>, vector<1x32xf32>
    %6 = vector.shape_cast %5 : vector<1x32xf32> to vector<32xf32>
    %7 = vector.shape_cast %6 : vector<32xf32> to vector<1x32xf32>
    %8 = vector.broadcast %7 : vector<1x32xf32> to vector<16x32xf32>
    %9 = arith.addf %4, %8 : vector<16x32xf32>
    %cst_6 = arith.constant 0.353553385 : f32
    %10 = vector.broadcast %cst_6 : f32 to vector<16x32xf32>
    %11 = arith.mulf %9, %10 : vector<16x32xf32>
    %c0_7 = arith.constant 0 : index
    %c0_8 = arith.constant 0 : index
    %12 = vector.load %arg3[%c0_7, %c0_8] : memref<32x32xbf16, #tpu.memory_space<vmem>>, vector<32x32xbf16>
    %cst_9 = arith.constant dense<0.000000e+00> : vector<16x32xf32>
    %13 = tpu.matmul %2, %12, %cst_9 {dimension_numbers = #tpu.dot_dimension_numbers<[1], [0], [0], [1], [0, 0, 1, 1], [], []>} : vector<16x32xbf16>, vector<32x32xbf16>, vector<16x32xf32> -> vector<16x32xf32>
    %c0_10 = arith.constant 0 : index
    %c0_11 = arith.constant 0 : index
    %14 = vector.load %arg6[%c0_10, %c0_11] : memref<1x32xf32, #tpu.memory_space<vmem>>, vector<1x32xf32>
    %15 = vector.shape_cast %14 : vector<1x32xf32> to vector<32xf32>
    %16 = vector.shape_cast %15 : vector<32xf32> to vector<1x32xf32>
    %17 = vector.broadcast %16 : vector<1x32xf32> to vector<16x32xf32>
    %18 = arith.addf %13, %17 : vector<16x32xf32>
    %c0_12 = arith.constant 0 : index
    %c0_13 = arith.constant 0 : index
    %19 = vector.load %arg4[%c0_12, %c0_13] : memref<32x32xbf16, #tpu.memory_space<vmem>>, vector<32x32xbf16>
    %cst_14 = arith.constant dense<0.000000e+00> : vector<16x32xf32>
    %20 = tpu.matmul %2, %19, %cst_14 {dimension_numbers = #tpu.dot_dimension_numbers<[1], [0], [0], [1], [0, 0, 1, 1], [], []>} : vector<16x32xbf16>, vector<32x32xbf16>, vector<16x32xf32> -> vector<16x32xf32>
    %c0_15 = arith.constant 0 : index
    %c0_16 = arith.constant 0 : index
    %21 = vector.load %arg7[%c0_15, %c0_16] : memref<1x32xf32, #tpu.memory_space<vmem>>, vector<1x32xf32>
    %22 = vector.shape_cast %21 : vector<1x32xf32> to vector<32xf32>
    %23 = vector.shape_cast %22 : vector<32xf32> to vector<1x32xf32>
    %24 = vector.broadcast %23 : vector<1x32xf32> to vector<16x32xf32>
    %25 = arith.addf %20, %24 : vector<16x32xf32>
    %26 = arith.truncf %11 : vector<16x32xf32> to vector<16x32xbf16>
    %27 = arith.truncf %18 : vector<16x32xf32> to vector<16x32xbf16>
    %28 = arith.truncf %25 : vector<16x32xf32> to vector<16x32xbf16>
    %29 = vector.extract_strided_slice %26 {offsets = [0, 0], sizes = [8, 8], strides = [1, 1]} : vector<16x32xbf16> to vector<8x8xbf16>
    %30 = vector.extract_strided_slice %27 {offsets = [0, 0], sizes = [8, 8], strides = [1, 1]} : vector<16x32xbf16> to vector<8x8xbf16>
    %31 = vector.extract_strided_slice %28 {offsets = [0, 0], sizes = [8, 8], strides = [1, 1]} : vector<16x32xbf16> to vector<8x8xbf16>
    %cst_17 = arith.constant dense<0.000000e+00> : vector<8x8xf32>
    %32 = tpu.matmul %29, %30, %cst_17 {dimension_numbers = #tpu.dot_dimension_numbers<[1], [1], [0], [0], [0, 0, 1, 0], [], []>} : vector<8x8xbf16>, vector<8x8xbf16>, vector<8x8xf32> -> vector<8x8xf32>
    %cst_18 = arith.constant dense<0xFF800000> : vector<8xf32>
    %33 = vector.multi_reduction <maximumf>, %32, %cst_18 [1] : vector<8x8xf32> to vector<8xf32>
    %34 = vector.shape_cast %33 : vector<8xf32> to vector<8x1xf32>
    %35 = vector.broadcast %34 : vector<8x1xf32> to vector<8x8xf32>
    %36 = arith.subf %32, %35 : vector<8x8xf32>
    %37 = math.exp %36 : vector<8x8xf32>
    %cst_19 = arith.constant dense<0.000000e+00> : vector<8xf32>
    %38 = vector.multi_reduction <add>, %37, %cst_19 [1] : vector<8x8xf32> to vector<8xf32>
    %39 = vector.shape_cast %38 : vector<8xf32> to vector<8x1xf32>
    %40 = tpu.reciprocal %39 {approx = true} : vector<8x1xf32> -> vector<8x1xf32>
    %41 = vector.broadcast %40 : vector<8x1xf32> to vector<8x8xf32>
    %42 = arith.mulf %37, %41 : vector<8x8xf32>
    %43 = arith.truncf %42 : vector<8x8xf32> to vector<8x8xbf16>
    %cst_20 = arith.constant dense<0.000000e+00> : vector<8x8xf32>
    %44 = tpu.matmul %43, %31, %cst_20 {dimension_numbers = #tpu.dot_dimension_numbers<[1], [0], [0], [1], [0, 0, 1, 1], [], []>} : vector<8x8xbf16>, vector<8x8xbf16>, vector<8x8xf32> -> vector<8x8xf32>
    %45 = arith.truncf %44 : vector<8x8xf32> to vector<8x8xbf16>
    %c0_21 = arith.constant 0 : index
    %c0_22 = arith.constant 0 : index
    %46 = vector.load %arg19[%c0_21, %c0_22] : memref<16x32xbf16, #tpu.memory_space<vmem>>, vector<8x8xbf16>
    tpu.vector_store %arg19[%c0_21, %c0_22], %45 {strides = array<i32>} : memref<16x32xbf16, #tpu.memory_space<vmem>>, vector<8x8xbf16>,
    %47 = vector.extract_strided_slice %26 {offsets = [0, 8], sizes = [8, 8], strides = [1, 1]} : vector<16x32xbf16> to vector<8x8xbf16>
    %48 = vector.extract_strided_slice %27 {offsets = [0, 8], sizes = [8, 8], strides = [1, 1]} : vector<16x32xbf16> to vector<8x8xbf16>
    %49 = vector.extract_strided_slice %28 {offsets = [0, 8], sizes = [8, 8], strides = [1, 1]} : vector<16x32xbf16> to vector<8x8xbf16>
    %cst_23 = arith.constant dense<0.000000e+00> : vector<8x8xf32>
    %50 = tpu.matmul %47, %48, %cst_23 {dimension_numbers = #tpu.dot_dimension_numbers<[1], [1], [0], [0], [0, 0, 1, 0], [], []>} : vector<8x8xbf16>, vector<8x8xbf16>, vector<8x8xf32> -> vector<8x8xf32>
    %cst_24 = arith.constant dense<0xFF800000> : vector<8xf32>
    %51 = vector.multi_reduction <maximumf>, %50, %cst_24 [1] : vector<8x8xf32> to vector<8xf32>
    %52 = vector.shape_cast %51 : vector<8xf32> to vector<8x1xf32>
    %53 = vector.broadcast %52 : vector<8x1xf32> to vector<8x8xf32>
    %54 = arith.subf %50, %53 : vector<8x8xf32>
    %55 = math.exp %54 : vector<8x8xf32>
    %cst_25 = arith.constant dense<0.000000e+00> : vector<8xf32>
    %56 = vector.multi_reduction <add>, %55, %cst_25 [1] : vector<8x8xf32> to vector<8xf32>
    %57 = vector.shape_cast %56 : vector<8xf32> to vector<8x1xf32>
    %58 = tpu.reciprocal %57 {approx = true} : vector<8x1xf32> -> vector<8x1xf32>
    %59 = vector.broadcast %58 : vector<8x1xf32> to vector<8x8xf32>
    %60 = arith.mulf %55, %59 : vector<8x8xf32>
    %61 = arith.truncf %60 : vector<8x8xf32> to vector<8x8xbf16>
    %cst_26 = arith.constant dense<0.000000e+00> : vector<8x8xf32>
    %62 = tpu.matmul %61, %49, %cst_26 {dimension_numbers = #tpu.dot_dimension_numbers<[1], [0], [0], [1], [0, 0, 1, 1], [], []>} : vector<8x8xbf16>, vector<8x8xbf16>, vector<8x8xf32> -> vector<8x8xf32>
    %63 = arith.truncf %62 : vector<8x8xf32> to vector<8x8xbf16>
    %c0_27 = arith.constant 0 : index
    %c8 = arith.constant 8 : index
    %64 = vector.load %arg19[%c0_27, %c8] : memref<16x32xbf16, #tpu.memory_space<vmem>>, vector<8x8xbf16>
    tpu.vector_store %arg19[%c0_27, %c8], %63 {strides = array<i32>} : memref<16x32xbf16, #tpu.memory_space<vmem>>, vector<8x8xbf16>,
    %65 = vector.extract_strided_slice %26 {offsets = [0, 16], sizes = [8, 8], strides = [1, 1]} : vector<16x32xbf16> to vector<8x8xbf16>
    %66 = vector.extract_strided_slice %27 {offsets = [0, 16], sizes = [8, 8], strides = [1, 1]} : vector<16x32xbf16> to vector<8x8xbf16>
    %67 = vector.extract_strided_slice %28 {offsets = [0, 16], sizes = [8, 8], strides = [1, 1]} : vector<16x32xbf16> to vector<8x8xbf16>
    %cst_28 = arith.constant dense<0.000000e+00> : vector<8x8xf32>
    %68 = tpu.matmul %65, %66, %cst_28 {dimension_numbers = #tpu.dot_dimension_numbers<[1], [1], [0], [0], [0, 0, 1, 0], [], []>} : vector<8x8xbf16>, vector<8x8xbf16>, vector<8x8xf32> -> vector<8x8xf32>
    %cst_29 = arith.constant dense<0xFF800000> : vector<8xf32>
    %69 = vector.multi_reduction <maximumf>, %68, %cst_29 [1] : vector<8x8xf32> to vector<8xf32>
    %70 = vector.shape_cast %69 : vector<8xf32> to vector<8x1xf32>
    %71 = vector.broadcast %70 : vector<8x1xf32> to vector<8x8xf32>
    %72 = arith.subf %68, %71 : vector<8x8xf32>
    %73 = math.exp %72 : vector<8x8xf32>
    %cst_30 = arith.constant dense<0.000000e+00> : vector<8xf32>
    %74 = vector.multi_reduction <add>, %73, %cst_30 [1] : vector<8x8xf32> to vector<8xf32>
    %75 = vector.shape_cast %74 : vector<8xf32> to vector<8x1xf32>
    %76 = tpu.reciprocal %75 {approx = true} : vector<8x1xf32> -> vector<8x1xf32>
    %77 = vector.broadcast %76 : vector<8x1xf32> to vector<8x8xf32>
    %78 = arith.mulf %73, %77 : vector<8x8xf32>
    %79 = arith.truncf %78 : vector<8x8xf32> to vector<8x8xbf16>
    %cst_31 = arith.constant dense<0.000000e+00> : vector<8x8xf32>
    %80 = tpu.matmul %79, %67, %cst_31 {dimension_numbers = #tpu.dot_dimension_numbers<[1], [0], [0], [1], [0, 0, 1, 1], [], []>} : vector<8x8xbf16>, vector<8x8xbf16>, vector<8x8xf32> -> vector<8x8xf32>
    %81 = arith.truncf %80 : vector<8x8xf32> to vector<8x8xbf16>
    %c0_32 = arith.constant 0 : index
    %c16 = arith.constant 16 : index
    %82 = vector.load %arg19[%c0_32, %c16] : memref<16x32xbf16, #tpu.memory_space<vmem>>, vector<8x8xbf16>
    tpu.vector_store %arg19[%c0_32, %c16], %81 {strides = array<i32>} : memref<16x32xbf16, #tpu.memory_space<vmem>>, vector<8x8xbf16>,
    %83 = vector.extract_strided_slice %26 {offsets = [0, 24], sizes = [8, 8], strides = [1, 1]} : vector<16x32xbf16> to vector<8x8xbf16>
    %84 = vector.extract_strided_slice %27 {offsets = [0, 24], sizes = [8, 8], strides = [1, 1]} : vector<16x32xbf16> to vector<8x8xbf16>
    %85 = vector.extract_strided_slice %28 {offsets = [0, 24], sizes = [8, 8], strides = [1, 1]} : vector<16x32xbf16> to vector<8x8xbf16>
    %cst_33 = arith.constant dense<0.000000e+00> : vector<8x8xf32>
    %86 = tpu.matmul %83, %84, %cst_33 {dimension_numbers = #tpu.dot_dimension_numbers<[1], [1], [0], [0], [0, 0, 1, 0], [], []>} : vector<8x8xbf16>, vector<8x8xbf16>, vector<8x8xf32> -> vector<8x8xf32>
    %cst_34 = arith.constant dense<0xFF800000> : vector<8xf32>
    %87 = vector.multi_reduction <maximumf>, %86, %cst_34 [1] : vector<8x8xf32> to vector<8xf32>
    %88 = vector.shape_cast %87 : vector<8xf32> to vector<8x1xf32>
    %89 = vector.broadcast %88 : vector<8x1xf32> to vector<8x8xf32>
    %90 = arith.subf %86, %89 : vector<8x8xf32>
    %91 = math.exp %90 : vector<8x8xf32>
    %cst_35 = arith.constant dense<0.000000e+00> : vector<8xf32>
    %92 = vector.multi_reduction <add>, %91, %cst_35 [1] : vector<8x8xf32> to vector<8xf32>
    %93 = vector.shape_cast %92 : vector<8xf32> to vector<8x1xf32>
    %94 = tpu.reciprocal %93 {approx = true} : vector<8x1xf32> -> vector<8x1xf32>
    %95 = vector.broadcast %94 : vector<8x1xf32> to vector<8x8xf32>
    %96 = arith.mulf %91, %95 : vector<8x8xf32>
    %97 = arith.truncf %96 : vector<8x8xf32> to vector<8x8xbf16>
    %cst_36 = arith.constant dense<0.000000e+00> : vector<8x8xf32>
    %98 = tpu.matmul %97, %85, %cst_36 {dimension_numbers = #tpu.dot_dimension_numbers<[1], [0], [0], [1], [0, 0, 1, 1], [], []>} : vector<8x8xbf16>, vector<8x8xbf16>, vector<8x8xf32> -> vector<8x8xf32>
    %99 = arith.truncf %98 : vector<8x8xf32> to vector<8x8xbf16>
    %c0_37 = arith.constant 0 : index
    %c24 = arith.constant 24 : index
    %100 = vector.load %arg19[%c0_37, %c24] : memref<16x32xbf16, #tpu.memory_space<vmem>>, vector<8x8xbf16>
    tpu.vector_store %arg19[%c0_37, %c24], %99 {strides = array<i32>} : memref<16x32xbf16, #tpu.memory_space<vmem>>, vector<8x8xbf16>,
    %101 = vector.extract_strided_slice %26 {offsets = [8, 0], sizes = [8, 8], strides = [1, 1]} : vector<16x32xbf16> to vector<8x8xbf16>
    %102 = vector.extract_strided_slice %27 {offsets = [8, 0], sizes = [8, 8], strides = [1, 1]} : vector<16x32xbf16> to vector<8x8xbf16>
    %103 = vector.extract_strided_slice %28 {offsets = [8, 0], sizes = [8, 8], strides = [1, 1]} : vector<16x32xbf16> to vector<8x8xbf16>
    %cst_38 = arith.constant dense<0.000000e+00> : vector<8x8xf32>
    %104 = tpu.matmul %101, %102, %cst_38 {dimension_numbers = #tpu.dot_dimension_numbers<[1], [1], [0], [0], [0, 0, 1, 0], [], []>} : vector<8x8xbf16>, vector<8x8xbf16>, vector<8x8xf32> -> vector<8x8xf32>
    %cst_39 = arith.constant dense<0xFF800000> : vector<8xf32>
    %105 = vector.multi_reduction <maximumf>, %104, %cst_39 [1] : vector<8x8xf32> to vector<8xf32>
    %106 = vector.shape_cast %105 : vector<8xf32> to vector<8x1xf32>
    %107 = vector.broadcast %106 : vector<8x1xf32> to vector<8x8xf32>
    %108 = arith.subf %104, %107 : vector<8x8xf32>
    %109 = math.exp %108 : vector<8x8xf32>
    %cst_40 = arith.constant dense<0.000000e+00> : vector<8xf32>
    %110 = vector.multi_reduction <add>, %109, %cst_40 [1] : vector<8x8xf32> to vector<8xf32>
    %111 = vector.shape_cast %110 : vector<8xf32> to vector<8x1xf32>
    %112 = tpu.reciprocal %111 {approx = true} : vector<8x1xf32> -> vector<8x1xf32>
    %113 = vector.broadcast %112 : vector<8x1xf32> to vector<8x8xf32>
    %114 = arith.mulf %109, %113 : vector<8x8xf32>
    %115 = arith.truncf %114 : vector<8x8xf32> to vector<8x8xbf16>
    %cst_41 = arith.constant dense<0.000000e+00> : vector<8x8xf32>
    %116 = tpu.matmul %115, %103, %cst_41 {dimension_numbers = #tpu.dot_dimension_numbers<[1], [0], [0], [1], [0, 0, 1, 1], [], []>} : vector<8x8xbf16>, vector<8x8xbf16>, vector<8x8xf32> -> vector<8x8xf32>
    %117 = arith.truncf %116 : vector<8x8xf32> to vector<8x8xbf16>
    %c8_42 = arith.constant 8 : index
    %c0_43 = arith.constant 0 : index
    %118 = vector.load %arg19[%c8_42, %c0_43] : memref<16x32xbf16, #tpu.memory_space<vmem>>, vector<8x8xbf16>
    tpu.vector_store %arg19[%c8_42, %c0_43], %117 {strides = array<i32>} : memref<16x32xbf16, #tpu.memory_space<vmem>>, vector<8x8xbf16>,
    %119 = vector.extract_strided_slice %26 {offsets = [8, 8], sizes = [8, 8], strides = [1, 1]} : vector<16x32xbf16> to vector<8x8xbf16>
    %120 = vector.extract_strided_slice %27 {offsets = [8, 8], sizes = [8, 8], strides = [1, 1]} : vector<16x32xbf16> to vector<8x8xbf16>
    %121 = vector.extract_strided_slice %28 {offsets = [8, 8], sizes = [8, 8], strides = [1, 1]} : vector<16x32xbf16> to vector<8x8xbf16>
    %cst_44 = arith.constant dense<0.000000e+00> : vector<8x8xf32>
    %122 = tpu.matmul %119, %120, %cst_44 {dimension_numbers = #tpu.dot_dimension_numbers<[1], [1], [0], [0], [0, 0, 1, 0], [], []>} : vector<8x8xbf16>, vector<8x8xbf16>, vector<8x8xf32> -> vector<8x8xf32>
    %cst_45 = arith.constant dense<0xFF800000> : vector<8xf32>
    %123 = vector.multi_reduction <maximumf>, %122, %cst_45 [1] : vector<8x8xf32> to vector<8xf32>
    %124 = vector.shape_cast %123 : vector<8xf32> to vector<8x1xf32>
    %125 = vector.broadcast %124 : vector<8x1xf32> to vector<8x8xf32>
    %126 = arith.subf %122, %125 : vector<8x8xf32>
    %127 = math.exp %126 : vector<8x8xf32>
    %cst_46 = arith.constant dense<0.000000e+00> : vector<8xf32>
    %128 = vector.multi_reduction <add>, %127, %cst_46 [1] : vector<8x8xf32> to vector<8xf32>
    %129 = vector.shape_cast %128 : vector<8xf32> to vector<8x1xf32>
    %130 = tpu.reciprocal %129 {approx = true} : vector<8x1xf32> -> vector<8x1xf32>
    %131 = vector.broadcast %130 : vector<8x1xf32> to vector<8x8xf32>
    %132 = arith.mulf %127, %131 : vector<8x8xf32>
    %133 = arith.truncf %132 : vector<8x8xf32> to vector<8x8xbf16>
    %cst_47 = arith.constant dense<0.000000e+00> : vector<8x8xf32>
    %134 = tpu.matmul %133, %121, %cst_47 {dimension_numbers = #tpu.dot_dimension_numbers<[1], [0], [0], [1], [0, 0, 1, 1], [], []>} : vector<8x8xbf16>, vector<8x8xbf16>, vector<8x8xf32> -> vector<8x8xf32>
    %135 = arith.truncf %134 : vector<8x8xf32> to vector<8x8xbf16>
    %c8_48 = arith.constant 8 : index
    %c8_49 = arith.constant 8 : index
    %136 = vector.load %arg19[%c8_48, %c8_49] : memref<16x32xbf16, #tpu.memory_space<vmem>>, vector<8x8xbf16>
    tpu.vector_store %arg19[%c8_48, %c8_49], %135 {strides = array<i32>} : memref<16x32xbf16, #tpu.memory_space<vmem>>, vector<8x8xbf16>,
    %137 = vector.extract_strided_slice %26 {offsets = [8, 16], sizes = [8, 8], strides = [1, 1]} : vector<16x32xbf16> to vector<8x8xbf16>
    %138 = vector.extract_strided_slice %27 {offsets = [8, 16], sizes = [8, 8], strides = [1, 1]} : vector<16x32xbf16> to vector<8x8xbf16>
    %139 = vector.extract_strided_slice %28 {offsets = [8, 16], sizes = [8, 8], strides = [1, 1]} : vector<16x32xbf16> to vector<8x8xbf16>
    %cst_50 = arith.constant dense<0.000000e+00> : vector<8x8xf32>
    %140 = tpu.matmul %137, %138, %cst_50 {dimension_numbers = #tpu.dot_dimension_numbers<[1], [1], [0], [0], [0, 0, 1, 0], [], []>} : vector<8x8xbf16>, vector<8x8xbf16>, vector<8x8xf32> -> vector<8x8xf32>
    %cst_51 = arith.constant dense<0xFF800000> : vector<8xf32>
    %141 = vector.multi_reduction <maximumf>, %140, %cst_51 [1] : vector<8x8xf32> to vector<8xf32>
    %142 = vector.shape_cast %141 : vector<8xf32> to vector<8x1xf32>
    %143 = vector.broadcast %142 : vector<8x1xf32> to vector<8x8xf32>
    %144 = arith.subf %140, %143 : vector<8x8xf32>
    %145 = math.exp %144 : vector<8x8xf32>
    %cst_52 = arith.constant dense<0.000000e+00> : vector<8xf32>
    %146 = vector.multi_reduction <add>, %145, %cst_52 [1] : vector<8x8xf32> to vector<8xf32>
    %147 = vector.shape_cast %146 : vector<8xf32> to vector<8x1xf32>
    %148 = tpu.reciprocal %147 {approx = true} : vector<8x1xf32> -> vector<8x1xf32>
    %149 = vector.broadcast %148 : vector<8x1xf32> to vector<8x8xf32>
    %150 = arith.mulf %145, %149 : vector<8x8xf32>
    %151 = arith.truncf %150 : vector<8x8xf32> to vector<8x8xbf16>
    %cst_53 = arith.constant dense<0.000000e+00> : vector<8x8xf32>
    %152 = tpu.matmul %151, %139, %cst_53 {dimension_numbers = #tpu.dot_dimension_numbers<[1], [0], [0], [1], [0, 0, 1, 1], [], []>} : vector<8x8xbf16>, vector<8x8xbf16>, vector<8x8xf32> -> vector<8x8xf32>
    %153 = arith.truncf %152 : vector<8x8xf32> to vector<8x8xbf16>
    %c8_54 = arith.constant 8 : index
    %c16_55 = arith.constant 16 : index
    %154 = vector.load %arg19[%c8_54, %c16_55] : memref<16x32xbf16, #tpu.memory_space<vmem>>, vector<8x8xbf16>
    tpu.vector_store %arg19[%c8_54, %c16_55], %153 {strides = array<i32>} : memref<16x32xbf16, #tpu.memory_space<vmem>>, vector<8x8xbf16>,
    %155 = vector.extract_strided_slice %26 {offsets = [8, 24], sizes = [8, 8], strides = [1, 1]} : vector<16x32xbf16> to vector<8x8xbf16>
    %156 = vector.extract_strided_slice %27 {offsets = [8, 24], sizes = [8, 8], strides = [1, 1]} : vector<16x32xbf16> to vector<8x8xbf16>
    %157 = vector.extract_strided_slice %28 {offsets = [8, 24], sizes = [8, 8], strides = [1, 1]} : vector<16x32xbf16> to vector<8x8xbf16>
    %cst_56 = arith.constant dense<0.000000e+00> : vector<8x8xf32>
    %158 = tpu.matmul %155, %156, %cst_56 {dimension_numbers = #tpu.dot_dimension_numbers<[1], [1], [0], [0], [0, 0, 1, 0], [], []>} : vector<8x8xbf16>, vector<8x8xbf16>, vector<8x8xf32> -> vector<8x8xf32>
    %cst_57 = arith.constant dense<0xFF800000> : vector<8xf32>
    %159 = vector.multi_reduction <maximumf>, %158, %cst_57 [1] : vector<8x8xf32> to vector<8xf32>
    %160 = vector.shape_cast %159 : vector<8xf32> to vector<8x1xf32>
    %161 = vector.broadcast %160 : vector<8x1xf32> to vector<8x8xf32>
    %162 = arith.subf %158, %161 : vector<8x8xf32>
    %163 = math.exp %162 : vector<8x8xf32>
    %cst_58 = arith.constant dense<0.000000e+00> : vector<8xf32>
    %164 = vector.multi_reduction <add>, %163, %cst_58 [1] : vector<8x8xf32> to vector<8xf32>
    %165 = vector.shape_cast %164 : vector<8xf32> to vector<8x1xf32>
    %166 = tpu.reciprocal %165 {approx = true} : vector<8x1xf32> -> vector<8x1xf32>
    %167 = vector.broadcast %166 : vector<8x1xf32> to vector<8x8xf32>
    %168 = arith.mulf %163, %167 : vector<8x8xf32>
    %169 = arith.truncf %168 : vector<8x8xf32> to vector<8x8xbf16>
    %cst_59 = arith.constant dense<0.000000e+00> : vector<8x8xf32>
    %170 = tpu.matmul %169, %157, %cst_59 {dimension_numbers = #tpu.dot_dimension_numbers<[1], [0], [0], [1], [0, 0, 1, 1], [], []>} : vector<8x8xbf16>, vector<8x8xbf16>, vector<8x8xf32> -> vector<8x8xf32>
    %171 = arith.truncf %170 : vector<8x8xf32> to vector<8x8xbf16>
    %c8_60 = arith.constant 8 : index
    %c24_61 = arith.constant 24 : index
    %172 = vector.load %arg19[%c8_60, %c24_61] : memref<16x32xbf16, #tpu.memory_space<vmem>>, vector<8x8xbf16>
    tpu.vector_store %arg19[%c8_60, %c24_61], %171 {strides = array<i32>} : memref<16x32xbf16, #tpu.memory_space<vmem>>, vector<8x8xbf16>,
    %c0_62 = arith.constant 0 : index
    %c0_63 = arith.constant 0 : index
    %173 = vector.load %arg19[%c0_62, %c0_63] : memref<16x32xbf16, #tpu.memory_space<vmem>>, vector<16x32xbf16>
    %c0_64 = arith.constant 0 : index
    %c0_65 = arith.constant 0 : index
    %174 = vector.load %arg8[%c0_64, %c0_65] : memref<32x32xbf16, #tpu.memory_space<vmem>>, vector<32x32xbf16>
    %cst_66 = arith.constant dense<0.000000e+00> : vector<16x32xf32>
    %175 = tpu.matmul %173, %174, %cst_66 {dimension_numbers = #tpu.dot_dimension_numbers<[1], [0], [0], [1], [0, 0, 1, 1], [], []>} : vector<16x32xbf16>, vector<32x32xbf16>, vector<16x32xf32> -> vector<16x32xf32>
    %c0_67 = arith.constant 0 : index
    %c0_68 = arith.constant 0 : index
    %176 = vector.load %arg9[%c0_67, %c0_68] : memref<1x32xf32, #tpu.memory_space<vmem>>, vector<1x32xf32>
    %177 = vector.shape_cast %176 : vector<1x32xf32> to vector<32xf32>
    %178 = vector.shape_cast %177 : vector<32xf32> to vector<1x32xf32>
    %179 = vector.broadcast %178 : vector<1x32xf32> to vector<16x32xf32>
    %180 = arith.addf %175, %179 : vector<16x32xf32>
    %181 = arith.addf %1, %180 : vector<16x32xf32>
    %c0_69 = arith.constant 0 : index
    %c0_70 = arith.constant 0 : index
    %182 = vector.load %arg10[%c0_69, %c0_70] : memref<1x32xf32, #tpu.memory_space<vmem>>, vector<1x32xf32>
    %183 = vector.shape_cast %182 : vector<1x32xf32> to vector<32xf32>
    %c0_71 = arith.constant 0 : index
    %c0_72 = arith.constant 0 : index
    %184 = vector.load %arg11[%c0_71, %c0_72] : memref<1x32xf32, #tpu.memory_space<vmem>>, vector<1x32xf32>
    %185 = vector.shape_cast %184 : vector<1x32xf32> to vector<32xf32>
    %cst_73 = arith.constant dense<0.000000e+00> : vector<16xf32>
    %186 = vector.multi_reduction <add>, %181, %cst_73 [1] : vector<16x32xf32> to vector<16xf32>
    %187 = vector.shape_cast %186 : vector<16xf32> to vector<16x1xf32>
    %cst_74 = arith.constant 3.200000e+01 : f32
    %188 = vector.broadcast %cst_74 : f32 to vector<16x1xf32>
    %189 = arith.divf %187, %188 : vector<16x1xf32>
    %190 = vector.broadcast %189 : vector<16x1xf32> to vector<16x32xf32>
    %191 = arith.subf %181, %190 : vector<16x32xf32>
    %192 = arith.mulf %191, %191 : vector<16x32xf32>
    %cst_75 = arith.constant dense<0.000000e+00> : vector<16xf32>
    %193 = vector.multi_reduction <add>, %192, %cst_75 [1] : vector<16x32xf32> to vector<16xf32>
    %194 = vector.shape_cast %193 : vector<16xf32> to vector<16x1xf32>
    %cst_76 = arith.constant 3.200000e+01 : f32
    %195 = vector.broadcast %cst_76 : f32 to vector<16x1xf32>
    %196 = arith.divf %194, %195 : vector<16x1xf32>
    %cst_77 = arith.constant 9.99999997E-7 : f32
    %197 = vector.broadcast %cst_77 : f32 to vector<16x1xf32>
    %198 = arith.addf %196, %197 : vector<16x1xf32>
    %199 = math.rsqrt %198 : vector<16x1xf32>
    %200 = vector.broadcast %199 : vector<16x1xf32> to vector<16x32xf32>
    %201 = arith.mulf %191, %200 : vector<16x32xf32>
    %202 = vector.shape_cast %183 : vector<32xf32> to vector<1x32xf32>
    %203 = vector.broadcast %202 : vector<1x32xf32> to vector<16x32xf32>
    %204 = arith.mulf %201, %203 : vector<16x32xf32>
    %205 = vector.shape_cast %185 : vector<32xf32> to vector<1x32xf32>
    %206 = vector.broadcast %205 : vector<1x32xf32> to vector<16x32xf32>
    %207 = arith.addf %204, %206 : vector<16x32xf32>
    %208 = arith.truncf %207 : vector<16x32xf32> to vector<16x32xbf16>
    %cst_78 = arith.constant 0.000000e+00 : f32
    %209 = vector.broadcast %cst_78 : f32 to vector<16x32xf32>
    %c0_79 = arith.constant 0 : index
    %c0_80 = arith.constant 0 : index
    %210 = vector.load %arg12[%c0_79, %c0_80] : memref<32x64xbf16, #tpu.memory_space<vmem>>, vector<32x64xbf16>
    %cst_81 = arith.constant dense<0.000000e+00> : vector<16x64xf32>
    %211 = tpu.matmul %208, %210, %cst_81 {dimension_numbers = #tpu.dot_dimension_numbers<[1], [0], [0], [1], [0, 0, 1, 1], [], []>} : vector<16x32xbf16>, vector<32x64xbf16>, vector<16x64xf32> -> vector<16x64xf32>
    %c0_82 = arith.constant 0 : index
    %c0_83 = arith.constant 0 : index
    %212 = vector.load %arg13[%c0_82, %c0_83] : memref<1x64xf32, #tpu.memory_space<vmem>>, vector<1x64xf32>
    %213 = vector.shape_cast %212 : vector<1x64xf32> to vector<64xf32>
    %214 = vector.shape_cast %213 : vector<64xf32> to vector<1x64xf32>
    %215 = vector.broadcast %214 : vector<1x64xf32> to vector<16x64xf32>
    %216 = arith.addf %211, %215 : vector<16x64xf32>
    %cst_84 = arith.constant 0.000000e+00 : f32
    %217 = vector.broadcast %cst_84 : f32 to vector<16x64xf32>
    %218 = arith.maximumf %216, %217 : vector<16x64xf32>
    %219 = arith.truncf %218 : vector<16x64xf32> to vector<16x64xbf16>
    %c0_85 = arith.constant 0 : index
    %c0_86 = arith.constant 0 : index
    %220 = vector.load %arg14[%c0_85, %c0_86] : memref<64x32xbf16, #tpu.memory_space<vmem>>, vector<64x32xbf16>
    %cst_87 = arith.constant dense<0.000000e+00> : vector<16x32xf32>
    %221 = tpu.matmul %219, %220, %cst_87 {dimension_numbers = #tpu.dot_dimension_numbers<[1], [0], [0], [1], [0, 0, 1, 1], [], []>} : vector<16x64xbf16>, vector<64x32xbf16>, vector<16x32xf32> -> vector<16x32xf32>
    %222 = arith.addf %209, %221 : vector<16x32xf32>
    %c0_88 = arith.constant 0 : index
    %c0_89 = arith.constant 0 : index
    %223 = vector.load %arg15[%c0_88, %c0_89] : memref<1x32xf32, #tpu.memory_space<vmem>>, vector<1x32xf32>
    %224 = vector.shape_cast %223 : vector<1x32xf32> to vector<32xf32>
    %225 = vector.shape_cast %224 : vector<32xf32> to vector<1x32xf32>
    %226 = vector.broadcast %225 : vector<1x32xf32> to vector<16x32xf32>
    %227 = arith.addf %222, %226 : vector<16x32xf32>
    %228 = arith.addf %207, %227 : vector<16x32xf32>
    %c0_90 = arith.constant 0 : index
    %c0_91 = arith.constant 0 : index
    %229 = vector.load %arg16[%c0_90, %c0_91] : memref<1x32xf32, #tpu.memory_space<vmem>>, vector<1x32xf32>
    %230 = vector.shape_cast %229 : vector<1x32xf32> to vector<32xf32>
    %c0_92 = arith.constant 0 : index
    %c0_93 = arith.constant 0 : index
    %231 = vector.load %arg17[%c0_92, %c0_93] : memref<1x32xf32, #tpu.memory_space<vmem>>, vector<1x32xf32>
    %232 = vector.shape_cast %231 : vector<1x32xf32> to vector<32xf32>
    %cst_94 = arith.constant dense<0.000000e+00> : vector<16xf32>
    %233 = vector.multi_reduction <add>, %228, %cst_94 [1] : vector<16x32xf32> to vector<16xf32>
    %234 = vector.shape_cast %233 : vector<16xf32> to vector<16x1xf32>
    %cst_95 = arith.constant 3.200000e+01 : f32
    %235 = vector.broadcast %cst_95 : f32 to vector<16x1xf32>
    %236 = arith.divf %234, %235 : vector<16x1xf32>
    %237 = vector.broadcast %236 : vector<16x1xf32> to vector<16x32xf32>
    %238 = arith.subf %228, %237 : vector<16x32xf32>
    %239 = arith.mulf %238, %238 : vector<16x32xf32>
    %cst_96 = arith.constant dense<0.000000e+00> : vector<16xf32>
    %240 = vector.multi_reduction <add>, %239, %cst_96 [1] : vector<16x32xf32> to vector<16xf32>
    %241 = vector.shape_cast %240 : vector<16xf32> to vector<16x1xf32>
    %cst_97 = arith.constant 3.200000e+01 : f32
    %242 = vector.broadcast %cst_97 : f32 to vector<16x1xf32>
    %243 = arith.divf %241, %242 : vector<16x1xf32>
    %cst_98 = arith.constant 9.99999997E-7 : f32
    %244 = vector.broadcast %cst_98 : f32 to vector<16x1xf32>
    %245 = arith.addf %243, %244 : vector<16x1xf32>
    %246 = math.rsqrt %245 : vector<16x1xf32>
    %247 = vector.broadcast %246 : vector<16x1xf32> to vector<16x32xf32>
    %248 = arith.mulf %238, %247 : vector<16x32xf32>
    %249 = vector.shape_cast %230 : vector<32xf32> to vector<1x32xf32>
    %250 = vector.broadcast %249 : vector<1x32xf32> to vector<16x32xf32>
    %251 = arith.mulf %248, %250 : vector<16x32xf32>
    %252 = vector.shape_cast %232 : vector<32xf32> to vector<1x32xf32>
    %253 = vector.broadcast %252 : vector<1x32xf32> to vector<16x32xf32>
    %254 = arith.addf %251, %253 : vector<16x32xf32>
    %255 = vector.shape_cast %254 : vector<16x32xf32> to vector<2x8x32xf32>
    %c0_99 = arith.constant 0 : index
    %c0_100 = arith.constant 0 : index
    %c0_101 = arith.constant 0 : index
    %256 = vector.load %arg18[%c0_99, %c0_100, %c0_101] : memref<2x8x32xf32, #tpu.memory_space<vmem>>, vector<2x8x32xf32>
    tpu.vector_store %arg18[%c0_99, %c0_100, %c0_101], %255 {strides = array<i32>} : memref<2x8x32xf32, #tpu.memory_space<vmem>>, vector<2x8x32xf32>,
    return
  }
  func.func @transform_0(%arg0: i32) -> (i32, i32, i32) {
    %c0_i32 = arith.constant 0 : i32
    %c0_i32_0 = arith.constant 0 : i32
    %c0_i32_1 = arith.constant 0 : i32
    return %arg0, %c0_i32, %c0_i32_0 : i32, i32, i32
  }
  func.func @transform_1(%arg0: i32) -> (i32, i32) {
    %c0_i32 = arith.constant 0 : i32
    %c0_i32_0 = arith.constant 0 : i32
    %c0_i32_1 = arith.constant 0 : i32
    return %c0_i32, %c0_i32_0 : i32, i32
  }
  func.func @transform_2(%arg0: i32) -> (i32, i32) {
    %c0_i32 = arith.constant 0 : i32
    %c0_i32_0 = arith.constant 0 : i32
    %c0_i32_1 = arith.constant 0 : i32
    return %c0_i32, %c0_i32_0 : i32, i32
  }
  func.func @transform_3(%arg0: i32) -> (i32, i32) {
    %c0_i32 = arith.constant 0 : i32
    %c0_i32_0 = arith.constant 0 : i32
    %c0_i32_1 = arith.constant 0 : i32
    return %c0_i32, %c0_i32_0 : i32, i32
  }
  func.func @transform_4(%arg0: i32) -> (i32, i32) {
    %c0_i32 = arith.constant 0 : i32
    %c0_i32_0 = arith.constant 0 : i32
    %c0_i32_1 = arith.constant 0 : i32
    return %c0_i32, %c0_i32_0 : i32, i32
  }
  func.func @transform_5(%arg0: i32) -> (i32, i32) {
    %c0_i32 = arith.constant 0 : i32
    %c0_i32_0 = arith.constant 0 : i32
    %c0_i32_1 = arith.constant 0 : i32
    return %c0_i32, %c0_i32_0 : i32, i32
  }
  func.func @transform_6(%arg0: i32) -> (i32, i32) {
    %c0_i32 = arith.constant 0 : i32
    %c0_i32_0 = arith.constant 0 : i32
    %c0_i32_1 = arith.constant 0 : i32
    return %c0_i32, %c0_i32_0 : i32, i32
  }
  func.func @transform_7(%arg0: i32) -> (i32, i32) {
    %c0_i32 = arith.constant 0 : i32
    %c0_i32_0 = arith.constant 0 : i32
    %c0_i32_1 = arith.constant 0 : i32
    return %c0_i32, %c0_i32_0 : i32, i32
  }
  func.func @transform_8(%arg0: i32) -> (i32, i32) {
    %c0_i32 = arith.constant 0 : i32
    %c0_i32_0 = arith.constant 0 : i32
    %c0_i32_1 = arith.constant 0 : i32
    return %c0_i32, %c0_i32_0 : i32, i32
  }
  func.func @transform_9(%arg0: i32) -> (i32, i32) {
    %c0_i32 = arith.constant 0 : i32
    %c0_i32_0 = arith.constant 0 : i32
    %c0_i32_1 = arith.constant 0 : i32
    return %c0_i32, %c0_i32_0 : i32, i32
  }
  func.func @transform_10(%arg0: i32) -> (i32, i32) {
    %c0_i32 = arith.constant 0 : i32
    %c0_i32_0 = arith.constant 0 : i32
    %c0_i32_1 = arith.constant 0 : i32
    return %c0_i32, %c0_i32_0 : i32, i32
  }
  func.func @transform_11(%arg0: i32) -> (i32, i32) {
    %c0_i32 = arith.constant 0 : i32
    %c0_i32_0 = arith.constant 0 : i32
    %c0_i32_1 = arith.constant 0 : i32
    return %c0_i32, %c0_i32_0 : i32, i32
  }
  func.func @transform_12(%arg0: i32) -> (i32, i32) {
    %c0_i32 = arith.constant 0 : i32
    %c0_i32_0 = arith.constant 0 : i32
    %c0_i32_1 = arith.constant 0 : i32
    return %c0_i32, %c0_i32_0 : i32, i32
  }
  func.func @transform_13(%arg0: i32) -> (i32, i32) {
    %c0_i32 = arith.constant 0 : i32
    %c0_i32_0 = arith.constant 0 : i32
    %c0_i32_1 = arith.constant 0 : i32
    return %c0_i32, %c0_i32_0 : i32, i32
  }
  func.func @transform_14(%arg0: i32) -> (i32, i32) {
    %c0_i32 = arith.constant 0 : i32
    %c0_i32_0 = arith.constant 0 : i32
    %c0_i32_1 = arith.constant 0 : i32
    return %c0_i32, %c0_i32_0 : i32, i32
  }
  func.func @transform_15(%arg0: i32) -> (i32, i32) {
    %c0_i32 = arith.constant 0 : i32
    %c0_i32_0 = arith.constant 0 : i32
    %c0_i32_1 = arith.constant 0 : i32
    return %c0_i32, %c0_i32_0 : i32, i32
  }
  func.func @transform_16(%arg0: i32) -> (i32, i32) {
    %c0_i32 = arith.constant 0 : i32
    %c0_i32_0 = arith.constant 0 : i32
    %c0_i32_1 = arith.constant 0 : i32
    return %c0_i32, %c0_i32_0 : i32, i32
  }
  func.func @transform_17(%arg0: i32) -> (i32, i32, i32) {
    %c0_i32 = arith.constant 0 : i32
    %c0_i32_0 = arith.constant 0 : i32
    %c0_i32_1 = arith.constant 0 : i32
    return %arg0, %c0_i32, %c0_i32_0 : i32, i32, i32
  }
}

</mosaic_0001>

<bundles_post_ra>
// kernel: tpu_custom_call.1
= control target key start
LH: loop header
LB: loop body
LE: loop exit
PB: predicated region body
PF: predicated region fallthrough
CT: control target
= control target key end

     0   :  { %s1572_s0 = inlined_call_operand.vmem [shape: f32[2,8,32], index: 0, kind: input, shape index: {}]   ;;  %s1573_s1 = inlined_call_operand.vmem [shape: bf16[32,32], index: 1, kind: input, shape index: {}]   ;;  %s1574_s2 = inlined_call_operand.vmem [shape: bf16[32,32], index: 2, kind: input, shape index: {}]   ;;  %s1575_s3 = inlined_call_operand.hbm [shape: bf16[32,32], index: 3, kind: input, shape index: {}]   ;;  %s1576_s4 = inlined_call_operand.vmem [shape: f32[1,32], index: 4, kind: input, shape index: {}]   ;;  %s1577_s5 = inlined_call_operand.vmem [shape: f32[1,32], index: 5, kind: input, shape index: {}]   ;;  %s1578_s6 = inlined_call_operand.vmem [shape: f32[1,32], index: 6, kind: input, shape index: {}]   ;;  %s1579_s7 = inlined_call_operand.hbm [shape: bf16[32,32], index: 7, kind: input, shape index: {}]   ;;  %s1580_s8 = inlined_call_operand.vmem [shape: f32[1,32], index: 8, kind: input, shape index: {}]   ;;  %s1581_s9 = inlined_call_operand.vmem [shape: f32[1,32], index: 9, kind: input, shape index: {}]   ;;  %s1582_s10 = inlined_call_operand.vmem [shape: f32[1,32], index: 10, kind: input, shape index: {}]   ;;  %s1583_s11 = inlined_call_operand.hbm [shape: bf16[32,64], index: 11, kind: input, shape index: {}]   ;;  %s1584_s12 = inlined_call_operand.vmem [shape: f32[1,64], index: 12, kind: input, shape index: {}]   ;;  %s1585_s13 = inlined_call_operand.vmem [shape: bf16[64,32], index: 13, kind: input, shape index: {}]   ;;  %s1586_s14 = inlined_call_operand.vmem [shape: f32[1,32], index: 14, kind: input, shape index: {}]   ;;  %s1587_s15 = inlined_call_operand.vmem [shape: f32[1,32], index: 15, kind: input, shape index: {}]   ;;  %s1588_s16 = inlined_call_operand.vmem [shape: f32[1,32], index: 16, kind: input, shape index: {}]   ;;  %s1589_s17 = inlined_call_operand.hbm [shape: f32[2,8,32], index: 17, kind: output, shape index: {}]  }
   0x1   :  { %1592 = sst [smem:[#allocation13_spill]] %s1572_s0 }
   0x2   :  { %1593 = sst [smem:[#allocation14_spill]] %s1573_s1 }
   0x3   :  { %22 = vsyncpa [#allocation4], 0 }
   0x4   :  { %23 = vsyncpa [#allocation7], 0 }
   0x5   :  { %24 = vsyncpa [#allocation5], 0  ;;  %s54_s26 = sshll.u32 %s1579_s7, 4  ;;  %s1271_s27 = smov [#allocation6]   ;;  %s55_s26 = int_to_ptr.hbm [resolvable:$true] %s54_s26 }
   0x6   :  { %s56_s28 = sshll.u32 %s1271_s27, 4  ;;  %s35_s30 = sshll.u32 %s1575_s3, 4  ;;  %s57_s28 = int_to_ptr.vmem [resolvable:$true] %s56_s28  ;;  %s36_s30 = int_to_ptr.hbm [resolvable:$true] %s35_s30 }
   0x7   :  { %s1272_s18 = smov 64   ;;  %s1273_s19 = smov 4  }
   0x8   :  { %62 = dma.hbm_to_vmem [thread:$0]  %s55_s26, 256, %s57_s28, [#allocation7], %s1272_s18, %s1272_s18, %s1273_s19  }
   0x9   :  { %s1274_s1 = smov [#allocation3]   ;;  %s73_s23 = sshll.u32 %s1583_s11, 4  ;;  %s74_s23 = int_to_ptr.hbm [resolvable:$true] %s73_s23 }
   0xa   :  { %s37_s20 = sshll.u32 %s1274_s1, 4  ;;  %s1275_s7 = smov [#allocation8]   ;;  %s38_s20 = int_to_ptr.vmem [resolvable:$true] %s37_s20 }
   0xb   :  { %43 = dma.hbm_to_vmem [thread:$0]  %s36_s30, 256, %s38_s20, [#allocation4], %s1272_s18, %s1272_s18, %s1273_s19  }
   0xc   :  { %s75_s24 = sshll.u32 %s1275_s7, 4  ;;  %s76_s24 = int_to_ptr.vmem [resolvable:$true] %s75_s24 }
   0xd   :  { %81 = dma.hbm_to_vmem [thread:$0]  %s74_s23, 256, %s76_s24, [#allocation7], %s1272_s18, %s1272_s18, %s1273_s19  }
   0xe   :  { %1265 = dma.done.wait [#allocation4], 256  }
   0xf   :  { %1266 = vsyncadd [#allocation4], 4294967040 }
  0x10   :  { %1267 = dma.done.wait [#allocation7], 512  }
  0x11   :  { %1268 = vsyncadd [#allocation7], 4294966784  ;;  %s1594_s26 = sld [smem:[#allocation14_spill]]  ;;  %v1091_v1 = vld [vmem:[%s1574_s2 + $0x8] sm:$0xff]  ;;  %v1090_v3 = vld [vmem:[%s1574_s2] sm:$0xff]  ;;  %vm128_vm0 = vcmask 261120  }
  0x12   :  { %s1595_s1 = sld [smem:[#allocation13_spill]]  ;;  %174 = vmatpush.bf16.msra.mxu1 %v1091_v1  ;;  %v1117_v7 = vld [vmem:[%s1576_s4] ss:$0 sm:$0xff]  ;;  %vm222_vm1 = vcmask 64512   ;;  %s1276_s4 = smov 112   ;;  %v1093_v33 = vld [vmem:[#allocation3 + $0x8] sm:$0xff] }
  0x13   :  { %v1118_v8 = vld [vmem:[%s1577_s5] ss:$0 sm:$0xff]  ;;  %s1277_s5 = smov 120   ;;  %s1278_s24 = smov 104   ;;  %208 = vmatpush.bf16.msra.mxu2 %v1093_v33  ;;  %v1092_v35 = vld [vmem:[#allocation3] sm:$0xff]  ;;  %vm257_vm2 = vcmask 1043456  }
  0x14   :  { %v1455_v61 = vld [vmem:[%s1578_s6] ss:$0 sm:$0xff]  ;;  %vm275_vm3 = vcmask 60416   ;;  %s1279_s6 = smov 8   ;;  %s1281_s27 = smov 24   ;;  %vm347_vm4 = vcmask 126016  }
  0x15   :  { %vm410_vm5 = vcmask 191616   ;;  %vm473_vm6 = vcmask 257216   ;;  %vm908_vm14 = vcmask 523264  }
  0x16   :  { %175 = vmatpush.bf16.msra.mxu1 %v1090_v3 }
  0x17   :  { %v1089_v0 = vld [vmem:[%s1594_s26 + $0x8] sm:$0xff]  ;;  %v1088_v2 = vld [vmem:[%s1594_s26] sm:$0xff]  ;;  %209 = vmatpush.bf16.msra.mxu2 %v1092_v35  ;;  %s1280_s26 = smov 16  }
  0x18   :  { %v1399_v4 = vld [vmem:[%s1595_s1] sm:$0xff]  ;;  %138 = vmatpush.bf16.msra.mxu0 %v1089_v0  ;;  %v1404_v5 = vld [vmem:[%s1595_s1 + $0x8] sm:$0xff] }
  0x19   :  { %v1408_v6 = vpack.c.bf16 %v1404_v5, %v1399_v4 }
  0x1b   :  { %1023 = vmatmul.msk.bf16.vlgmr.msra.gmra.mxu1 %vm128_vm0, %v1408_v6  ;;  %1032 = vmatmul.msk.bf16.vlgmr.msra.gmra.mxu2 %vm128_vm0, %v1408_v6 }
  0x1c   :  { %139 = vmatpush.bf16.msra.mxu0 %v1088_v2 }
  0x1f   :  { %1014 = vmatmul.msk.bf16.vlgmr.msra.gmra.mxu0 %vm128_vm0, %v1408_v6 }
  0x98   :  { %v177_v10 = vpop.f32.mrf.mxu1 }
  0x99   :  { %v178_v12 = vadd.f32 %v1118_v8, %v177_v10 }
  0x9b   :  { %v218_v14 = vpack.c.bf16 %v178_v12, %v178_v12 }
  0x9c   :  { %v141_v9 = vpop.f32.mrf.mxu0 }
  0x9d   :  { %v142_v11 = vadd.f32 %v1117_v7, %v141_v9  ;;  %v283_v16 = vunpack.c.l.b16 %v218_v14  ;;  %v227_v17 = vsel %vm222_vm1, %v218_v14, 0 }
  0x9e   :  { %236 = vmatpush.bf16.xpose.msra.mxu3 %v227_v17  ;;  %v211_v0 = vpop.f32.mrf.mxu2 }
  0x9f   :  { %v146_v13 = vmul.f32 0.35355338, %v142_v11  ;;  %v284_v19 = vpack.c.b16 %v283_v16, %v283_v16  ;;  %v212_v2 = vadd.f32 %v1455_v61, %v211_v0 }
  0xa0   :  { %v179_v20 = vpop.f32.mrf.mxu1 }
  0xa1   :  { %v216_v15 = vpack.c.bf16 %v146_v13, %v146_v13  ;;  %351 = vrot.lane.b32.xlu1 %v284_v19, %s1276_s4  ;;  %285 = vrot.lane.b32.xlu0 %v284_v19, %s1277_s5  ;;  %v180_v24 = vadd.f32 %v1118_v8, %v179_v20  ;;  %v220_v3 = vpack.c.bf16 %v212_v2, %v212_v2 }
  0xa3   :  { %v278_v18 = vunpack.c.l.b16 %v216_v15  ;;  %v219_v26 = vpack.c.bf16 %v180_v24, %v180_v24  ;;  %v259_v6 = vsel %vm257_vm2, %v220_v3, 0 }
  0xa4   :  { %v143_v21 = vpop.f32.mrf.mxu0  ;;  %268 = vmatpush.bf16.msrb.mxu0 %v259_v6 }
  0xa5   :  { %v279_v22 = vpack.c.b16 %v278_v18, %v278_v18  ;;  %v144_v23 = vadd.f32 %v1117_v7, %v143_v21  ;;  %1033 = vmatmul.msk.bf16.vlgmr.msra.gmra.mxu3 %vm222_vm1, %v216_v15  ;;  %v533_v28 = vunpack.c.l.b16 %v219_v26  ;;  %v479_v40 = vsel %vm222_vm1, %v219_v26, 0 }
  0xa6   :  { %v319_v21 = vunpack.c.l.b16 %v220_v3 }
  0xa7   :  { %349 = vrot.lane.b32.xlu2 %v279_v22, %s1276_s4  ;;  %v147_v25 = vmul.f32 0.35355338, %v144_v23  ;;  %v534_v30 = vpack.c.b16 %v533_v28, %v533_v28 }
  0xa9   :  { %v217_v27 = vpack.c.bf16 %v147_v25, %v147_v25  ;;  %414 = vrot.lane.b32.xlu1 %v284_v19, %s1278_s24  ;;  %280 = vrot.lane.b32.xlu0 %v279_v22, %s1277_s5 }
  0xab   :  { %v528_v29 = vunpack.c.l.b16 %v217_v27 }
  0xad   :  { %v529_v31 = vpack.c.b16 %v528_v29, %v528_v29 }
  0xaf   :  { %412 = vrot.lane.b32.xlu2 %v279_v22, %s1278_s24  ;;  %v320_v22 = vpack.c.b16 %v319_v21, %v319_v21 }
  0xb1   :  { %530 = vrot.lane.b32.xlu1 %v529_v31, %s1277_s5  ;;  %535 = vrot.lane.b32.xlu0 %v534_v30, %s1277_s5 }
  0xb7   :  { %600 = vrot.lane.b32.xlu2 %v534_v30, %s1276_s4 }
  0xb9   :  { %598 = vrot.lane.b32.xlu1 %v529_v31, %s1276_s4  ;;  %662 = vrot.lane.b32.xlu0 %v534_v30, %s1278_s24 }
  0xbf   :  { %660 = vrot.lane.b32.xlu2 %v529_v31, %s1278_s24 }
 0x101   :  { %v350_v32 = vpop.permute.xlu2 %349 }
 0x109   :  { %v413_v34 = vpop.permute.xlu2 %412 }
 0x111   :  { %v601_v41 = vpop.permute.xlu2 %600 }
 0x112   :  { %v606_v44 = vsel %vm222_vm1, %v601_v41, 0 }
 0x113   :  { %v352_v36 = vpop.permute.xlu1 %351  ;;  %v286_v37 = vpop.permute.xlu0 %285 }
 0x114   :  { %v291_v38 = vsel %vm222_vm1, %v286_v37, 0  ;;  %v357_v39 = vsel %vm222_vm1, %v352_v36, 0 }
 0x115   :  { %300 = vmatpush.bf16.xpose.msrb.mxu1 %v291_v38  ;;  %366 = vmatpush.bf16.xpose.msrb.mxu3 %v357_v39  ;;  %v213_v39 = vpop.f32.mrf.mxu2 }
 0x119   :  { %v661_v55 = vpop.permute.xlu2 %660 }
 0x11b   :  { %v415_v42 = vpop.permute.xlu1 %414  ;;  %v281_v43 = vpop.permute.xlu0 %280 }
 0x11c   :  { %v420_v45 = vsel %vm222_vm1, %v415_v42, 0  ;;  %1035 = vmatmul.msk.bf16.vlgmr.msrb.gmra.mxu1 %vm222_vm1, %v281_v43  ;;  %1037 = vmatmul.msk.bf16.vlgmr.msrb.gmra.mxu3 %vm222_vm1, %v350_v32 }
 0x11d   :  { %488 = vmatpush.bf16.xpose.msra.mxu3 %v479_v40  ;;  %429 = vmatpush.bf16.xpose.msra.mxu1 %v420_v45 }
 0x123   :  { %v536_v46 = vpop.permute.xlu0 %535  ;;  %v531_v53 = vpop.permute.xlu1 %530 }
 0x124   :  { %v541_v47 = vsel %vm222_vm1, %v536_v46, 0 }
 0x125   :  { %615 = vmatpush.bf16.xpose.msrb.mxu3 %v606_v44  ;;  %550 = vmatpush.bf16.xpose.msrb.mxu1 %v541_v47  ;;  %v214_v44 = vadd.f32 %v1455_v61, %v213_v39 }
 0x128   :  { %v238_v48 = vpop.f32.mrf.mxu3 }
 0x129   :  { %v242_v49 = vsel %vm222_vm1, %v238_v48, -inf }
 0x12a   :  { %243 = vmax.xlane.f32.xlu1 %v242_v49 }
 0x12b   :  { %v663_v50 = vpop.permute.xlu0 %662  ;;  %v599_v54 = vpop.permute.xlu1 %598 }
 0x12c   :  { %v668_v51 = vsel %vm222_vm1, %v663_v50, 0  ;;  %1039 = vmatmul.msk.bf16.vlgmr.msra.gmra.mxu1 %vm222_vm1, %v413_v34  ;;  %1041 = vmatmul.msk.bf16.vlgmr.msra.gmra.mxu3 %vm222_vm1, %v217_v27 }
 0x12d   :  { %677 = vmatpush.bf16.xpose.msra.mxu1 %v668_v51 }
 0x130   :  { %v240_v52 = vpop.f32.mrf.mxu3 }
 0x13c   :  { %1043 = vmatmul.msk.bf16.vlgmr.msrb.gmra.mxu1 %vm222_vm1, %v531_v53  ;;  %1045 = vmatmul.msk.bf16.vlgmr.msrb.gmra.mxu3 %vm222_vm1, %v599_v54 }
 0x14c   :  { %1047 = vmatmul.msk.bf16.vlgmr.msra.gmra.mxu1 %vm222_vm1, %v661_v55 }
 0x199   :  { %v302_v56 = vpop.f32.mrf.mxu1 }
 0x19a   :  { %v306_v57 = vsel %vm222_vm1, %v302_v56, -inf }
 0x19b   :  { %307 = vmax.xlane.f32.xlu0 %v306_v57 }
 0x19d   :  { %v244_v58 = vpop.xlane.xlu1 %243 }
 0x19e   :  { %v245_v59 = vsub.f32 %v238_v48, %v244_v58  ;;  %v221_v48 = vpack.c.bf16 %v214_v44, %v214_v44 }
 0x19f   :  { %v368_v60 = vpop.f32.mrf.mxu3 }
 0x1a0   :  { %v246_v62 = vmul.f32 1.442695, %v245_v59  ;;  %v372_v63 = vsel %vm222_vm1, %v368_v60, -inf  ;;  %v510_v53 = vsel %vm257_vm2, %v221_v48, 0  ;;  %v569_v58 = vunpack.c.l.b16 %v221_v48 }
 0x1a1   :  { %v304_v1 = vpop.f32.mrf.mxu1  ;;  %373 = vmax.xlane.f32.xlu2 %v372_v63 }
 0x1a2   :  { %1127 = vpow2.f32 %v246_v62  ;;  %v570_v62 = vpack.c.b16 %v569_v58, %v569_v58 }
 0x1a7   :  { %v370_v7 = vpop.f32.mrf.mxu3 }
 0x1a8   :  { %v1128_v8 = vpop.eup %1127 }
 0x1a9   :  { %v431_v9 = vpop.f32.mrf.mxu1  ;;  %v248_v10 = vsel %vm222_vm1, %v1128_v8, 0.0 }
 0x1aa   :  { %249 = vadd.xlane.f32.xlu2 %v248_v10  ;;  %v435_v14 = vsel %vm222_vm1, %v431_v9, -inf }
 0x1af   :  { %v490_v11 = vpop.f32.mrf.mxu3 }
 0x1b0   :  { %v494_v12 = vsel %vm222_vm1, %v490_v11, -inf }
 0x1b1   :  { %v433_v13 = vpop.f32.mrf.mxu1  ;;  %495 = vmax.xlane.f32.xlu1 %v494_v12 }
 0x1b2   :  { %436 = vmax.xlane.f32.xlu2 %v435_v14 }
 0x1b7   :  { %v492_v15 = vpop.f32.mrf.mxu3 }
 0x1b9   :  { %v552_v16 = vpop.f32.mrf.mxu1 }
 0x1ba   :  { %v556_v17 = vsel %vm222_vm1, %v552_v16, -inf }
 0x1bb   :  { %557 = vmax.xlane.f32.xlu0 %v556_v17 }
 0x1bf   :  { %v617_v18 = vpop.f32.mrf.mxu3 }
 0x1c0   :  { %v621_v19 = vsel %vm222_vm1, %v617_v18, -inf }
 0x1c1   :  { %v554_v20 = vpop.f32.mrf.mxu1  ;;  %622 = vmax.xlane.f32.xlu1 %v621_v19 }
 0x1c7   :  { %v619_v23 = vpop.f32.mrf.mxu3 }
 0x1c9   :  { %v1465_v24 = vpop.f32.mrf.mxu1 }
 0x1ca   :  { %384 = vrot.lane.b32.xlu2 %v320_v22, %s1276_s4  ;;  %v683_v26 = vsel %vm222_vm1, %v1465_v24, -inf }
 0x1cf   :  { %321 = vrot.lane.b32.xlu0 %v320_v22, %s1277_s5 }
 0x1d1   :  { %v681_v25 = vpop.f32.mrf.mxu1 }
 0x1da   :  { %447 = vrot.lane.b32.xlu1 %v320_v22, %s1278_s24 }
 0x1f3   :  { %684 = vmax.xlane.f32.xlu2 %v683_v26 }
 0x20e   :  { %v308_v27 = vpop.xlane.xlu0 %307 }
 0x20f   :  { %v309_v28 = vsub.f32 %v302_v56, %v308_v27 }
 0x211   :  { %v310_v29 = vmul.f32 1.442695, %v309_v28 }
 0x213   :  { %1129 = vpow2.f32 %v310_v29 }
 0x214   :  { %v374_v30 = vpop.xlane.xlu2 %373 }
 0x215   :  { %v375_v31 = vsub.f32 %v368_v60, %v374_v30 }
 0x217   :  { %v376_v32 = vmul.f32 1.442695, %v375_v31 }
 0x219   :  { %v1472_v33 = vpop.eup %1129  ;;  %1131 = vpow2.f32 %v376_v32 }
 0x21a   :  { %v312_v34 = vsel %vm222_vm1, %v1472_v33, 0.0 }
 0x21b   :  { %313 = vadd.xlane.f32.xlu0 %v312_v34 }
 0x21d   :  { %v250_v35 = vpop.xlane.xlu2 %249 }
 0x21e   :  { %1133 = vrcp.f32 %v250_v35 }
 0x21f   :  { %v1476_v36 = vpop.eup %1131 }
 0x220   :  { %v378_v37 = vsel %vm222_vm1, %v1476_v36, 0.0 }
 0x221   :  { %379 = vadd.xlane.f32.xlu2 %v378_v37 }
 0x224   :  { %v1134_v38 = vpop.eup %1133  ;;  %v496_v41 = vpop.xlane.xlu1 %495 }
 0x225   :  { %v252_v40 = vmul.f32 %v1134_v38, %v1128_v8  ;;  %v437_v42 = vpop.xlane.xlu2 %436  ;;  %v497_v46 = vsub.f32 %v490_v11, %v496_v41 }
 0x226   :  { %v438_v43 = vsub.f32 %v431_v9, %v437_v42 }
 0x227   :  { %v253_v45 = vpack.c.bf16 %v252_v40, %v252_v40  ;;  %v498_v49 = vmul.f32 1.442695, %v497_v46 }
 0x228   :  { %v439_v47 = vmul.f32 1.442695, %v438_v43 }
 0x229   :  { %1034 = vmatmul.msk.bf16.vlgmr.msrb.gmra.mxu0 %vm222_vm1, %v253_v45 }
 0x22a   :  { %1135 = vpow2.f32 %v439_v47 }
 0x22b   :  { %1137 = vpow2.f32 %v498_v49 }
 0x22d   :  { %v385_v50 = vpop.permute.xlu2 %384 }
 0x22e   :  { %v390_v51 = vsel %vm257_vm2, %v385_v50, 0  ;;  %v558_v52 = vpop.xlane.xlu0 %557 }
 0x22f   :  { %v559_v54 = vsub.f32 %v552_v16, %v558_v52  ;;  %399 = vmatpush.bf16.msra.mxu0 %v390_v51 }
 0x230   :  { %v1136_v55 = vpop.eup %1135 }
 0x231   :  { %v560_v56 = vmul.f32 1.442695, %v559_v54  ;;  %v441_v57 = vsel %vm222_vm1, %v1136_v55, 0.0  ;;  %v1138_v61 = vpop.eup %1137 }
 0x232   :  { %442 = vadd.xlane.f32.xlu1 %v441_v57  ;;  %v500_v1 = vsel %vm222_vm1, %v1138_v61, 0.0 }
 0x233   :  { %519 = vmatpush.bf16.msrb.mxu0 %v510_v53  ;;  %1139 = vpow2.f32 %v560_v56 }
 0x234   :  { %v623_v59 = vpop.xlane.xlu1 %622 }
 0x235   :  { %v624_v60 = vsub.f32 %v617_v18, %v623_v59 }
 0x237   :  { %v625_v63 = vmul.f32 1.442695, %v624_v60 }
 0x239   :  { %v1140_v0 = vpop.eup %1139  ;;  %1141 = vpow2.f32 %v625_v63  ;;  %571 = vrot.lane.b32.xlu2 %v570_v62, %s1277_s5 }
 0x23a   :  { %501 = vadd.xlane.f32.xlu1 %v500_v1  ;;  %v562_v2 = vsel %vm222_vm1, %v1140_v0, 0.0 }
 0x23b   :  { %563 = vadd.xlane.f32.xlu0 %v562_v2 }
 0x23f   :  { %v1142_v3 = vpop.eup %1141 }
 0x240   :  { %v627_v7 = vsel %vm222_vm1, %v1142_v3, 0.0 }
 0x241   :  { %v322_v6 = vpop.permute.xlu0 %321 }
 0x242   :  { %v327_v8 = vsel %vm257_vm2, %v322_v6, 0 }
 0x243   :  { %628 = vadd.xlane.f32.xlu0 %v627_v7  ;;  %336 = vmatpush.bf16.msrb.mxu2 %v327_v8 }
 0x24c   :  { %v448_v9 = vpop.permute.xlu1 %447 }
 0x24d   :  { %v453_v10 = vsel %vm257_vm2, %v448_v9, 0 }
 0x24e   :  { %462 = vmatpush.bf16.msra.mxu2 %v453_v10 }
 0x253   :  { %633 = vrot.lane.b32.xlu1 %v570_v62, %s1276_s4 }
 0x257   :  { %695 = vrot.lane.b32.xlu0 %v570_v62, %s1278_s24 }
 0x266   :  { %v685_v11 = vpop.xlane.xlu2 %684 }
 0x267   :  { %v686_v12 = vsub.f32 %v1465_v24, %v685_v11 }
 0x269   :  { %v687_v13 = vmul.f32 1.442695, %v686_v12 }
 0x26b   :  { %1143 = vpow2.f32 %v687_v13 }
 0x271   :  { %v1144_v14 = vpop.eup %1143 }
 0x272   :  { %v689_v15 = vsel %vm222_vm1, %v1144_v14, 0.0 }
 0x273   :  { %690 = vadd.xlane.f32.xlu2 %v689_v15 }
 0x28e   :  { %v314_v16 = vpop.xlane.xlu0 %313 }
 0x28f   :  { %1145 = vrcp.f32 %v314_v16 }
 0x294   :  { %v380_v17 = vpop.xlane.xlu2 %379 }
 0x295   :  { %v1146_v18 = vpop.eup %1145  ;;  %1147 = vrcp.f32 %v380_v17  ;;  %v1096_v17 = vld [vmem:[#allocation6 + $0x8] sm:$0xff] }
 0x296   :  { %v316_v19 = vmul.f32 %v1146_v18, %v1472_v33  ;;  %758 = vmatpush.bf16.msra.mxu3 %v1096_v17  ;;  %v1095_v18 = vld [vmem:[#allocation6] sm:$0xff]  ;;  %v1099_v17 = vld [vmem:[%s1585_s13] sm:$0xff] }
 0x298   :  { %v317_v20 = vpack.c.bf16 %v316_v19, %v316_v19 }
 0x29a   :  { %1036 = vmatmul.msk.bf16.vlgmr.msrb.gmra.mxu2 %vm222_vm1, %v317_v20  ;;  %759 = vmatpush.bf16.msra.mxu3 %v1095_v18 }
 0x29b   :  { %v1148_v21 = vpop.eup %1147 }
 0x29c   :  { %v382_v22 = vmul.f32 %v1148_v21, %v1476_v36  ;;  %v572_v23 = vpop.permute.xlu2 %571  ;;  %v1120_v21 = vld [vmem:[%s1580_s8] ss:$0 sm:$0xff] }
 0x29d   :  { %v577_v24 = vsel %vm257_vm2, %v572_v23, 0 }
 0x29e   :  { %v383_v25 = vpack.c.bf16 %v382_v22, %v382_v22  ;;  %586 = vmatpush.bf16.msrb.mxu2 %v577_v24 }
 0x2a0   :  { %1038 = vmatmul.msk.bf16.vlgmr.msra.gmra.mxu0 %vm222_vm1, %v383_v25 }
 0x2a5   :  { %v443_v26 = vpop.xlane.xlu1 %442 }
 0x2a6   :  { %1149 = vrcp.f32 %v443_v26  ;;  %v270_v27 = vpop.f32.mrf.mxu0 }
 0x2a7   :  { %v274_v28 = vpack.c.bf16 %v270_v27, %v270_v27 }
 0x2a9   :  { %276 = vst.msk [vmem:[#allocation2] sm:$0xf] %vm275_vm3, %v274_v28 }
 0x2ac   :  { %v1150_v29 = vpop.eup %1149 }
 0x2ad   :  { %v445_v30 = vmul.f32 %v1150_v29, %v1136_v55  ;;  %v502_v31 = vpop.xlane.xlu1 %501 }
 0x2ae   :  { %1151 = vrcp.f32 %v502_v31  ;;  %v564_v32 = vpop.xlane.xlu0 %563  ;;  %v272_v33 = vpop.f32.mrf.mxu0 }
 0x2af   :  { %v446_v34 = vpack.c.bf16 %v445_v30, %v445_v30  ;;  %1153 = vrcp.f32 %v564_v32  ;;  %v1282_v30 = vmov 32.0  }
 0x2b1   :  { %1040 = vmatmul.msk.bf16.vlgmr.msra.gmra.mxu2 %vm222_vm1, %v446_v34 }
 0x2b4   :  { %v1152_v35 = vpop.eup %1151 }
 0x2b5   :  { %v504_v36 = vmul.f32 %v1152_v35, %v1138_v61  ;;  %v1154_v38 = vpop.eup %1153 }
 0x2b6   :  { %v629_v39 = vpop.xlane.xlu0 %628  ;;  %v566_v40 = vmul.f32 %v1154_v38, %v1140_v0 }
 0x2b7   :  { %v505_v37 = vpack.c.bf16 %v504_v36, %v504_v36  ;;  %1155 = vrcp.f32 %v629_v39 }
 0x2b8   :  { %v567_v41 = vpack.c.bf16 %v566_v40, %v566_v40 }
 0x2b9   :  { %1042 = vmatmul.msk.bf16.vlgmr.msrb.gmra.mxu0 %vm222_vm1, %v505_v37 }
 0x2bd   :  { %v1156_v42 = vpop.eup %1155 }
 0x2be   :  { %v631_v43 = vmul.f32 %v1156_v42, %v1142_v3 }
 0x2c0   :  { %v632_v46 = vpack.c.bf16 %v631_v43, %v631_v43 }
 0x2c1   :  { %1044 = vmatmul.msk.bf16.vlgmr.msrb.gmra.mxu2 %vm222_vm1, %v567_v41 }
 0x2c5   :  { %v634_v44 = vpop.permute.xlu1 %633 }
 0x2c6   :  { %v639_v45 = vsel %vm257_vm2, %v634_v44, 0 }
 0x2c7   :  { %648 = vmatpush.bf16.msra.mxu0 %v639_v45  ;;  %v1098_v45 = vld [vmem:[#allocation8 + $0x8] sm:$0xff] }
 0x2c9   :  { %v696_v47 = vpop.permute.xlu0 %695 }
 0x2ca   :  { %v701_v48 = vsel %vm257_vm2, %v696_v47, 0  ;;  %1046 = vmatmul.msk.bf16.vlgmr.msra.gmra.mxu0 %vm222_vm1, %v632_v46 }
 0x2cb   :  { %710 = vmatpush.bf16.msra.mxu2 %v701_v48  ;;  %861 = vmatpush.bf16.msrb.mxu0 %v1098_v45  ;;  %v1097_v48 = vld [vmem:[#allocation8] sm:$0xff] }
 0x2cf   :  { %862 = vmatpush.bf16.msrb.mxu0 %v1097_v48 }
 0x2e6   :  { %v691_v49 = vpop.xlane.xlu2 %690 }
 0x2e7   :  { %1157 = vrcp.f32 %v691_v49 }
 0x2e8   :  { %1159 = vrcp.f32 %v1282_v30 }
 0x2ed   :  { %v1158_v50 = vpop.eup %1157 }
 0x2ee   :  { %v693_v51 = vmul.f32 %v1158_v50, %v1144_v14  ;;  %v1160_v31 = vpop.eup %1159 }
 0x2ef   :  { %v777_v32 = vmul.f32 32.0, %v1160_v31  ;;  %vm781_vm7 = vweird.f32 %v1160_v31 }
 0x2f0   :  { %v694_v52 = vpack.c.bf16 %v693_v51, %v693_v51 }
 0x2f1   :  { %v778_v33 = vsub.f32 1.0, %v777_v32 }
 0x2f2   :  { %1048 = vmatmul.msk.bf16.vlgmr.msra.gmra.mxu2 %vm222_vm1, %v694_v52 }
 0x2f3   :  { %v779_v34 = vmul.f32 %v1160_v31, %v778_v33 }
 0x2f5   :  { %v780_v35 = vadd.f32 %v1160_v31, %v779_v34 }
 0x2f7   :  { %v1519_v36 = vsel %vm781_vm7, %v1160_v31, %v780_v35 }
 0x31d   :  { %v338_v53 = vpop.f32.mrf.mxu2  ;;  %v401_v54 = vpop.f32.mrf.mxu0 }
 0x31e   :  { %v342_v55 = vpack.c.bf16 %v338_v53, %v338_v53  ;;  %v405_v56 = vpack.c.bf16 %v401_v54, %v401_v54 }
 0x320   :  { %344 = vrot.lane.b32.xlu2 %v342_v55, %s1279_s6  ;;  %407 = vrot.lane.b32.xlu0 %v405_v56, %s1280_s26 }
 0x325   :  { %v340_v57 = vpop.f32.mrf.mxu2  ;;  %v403_v58 = vpop.f32.mrf.mxu0 }
 0x334   :  { %v464_v59 = vpop.f32.mrf.mxu2 }
 0x335   :  { %v468_v7 = vpack.c.bf16 %v464_v59, %v464_v59 }
 0x336   :  { %v521_v60 = vpop.f32.mrf.mxu0 }
 0x337   :  { %v525_v61 = vpack.c.bf16 %v521_v60, %v521_v60 }
 0x339   :  { %526 = vst.msk [vmem:[#allocation2 + $0x4] sm:$0xf] %vm275_vm3, %v525_v61 }
 0x33c   :  { %v466_v62 = vpop.f32.mrf.mxu2 }
 0x33e   :  { %v523_v63 = vpop.f32.mrf.mxu0 }
 0x344   :  { %v588_v0 = vpop.f32.mrf.mxu2 }
 0x345   :  { %v592_v1 = vpack.c.bf16 %v588_v0, %v588_v0 }
 0x347   :  { %594 = vrot.lane.b32.xlu0 %v592_v1, %s1279_s6  ;;  %v650_v2 = vpop.f32.mrf.mxu0  ;;  %v1121_v1 = vld [vmem:[%s1581_s9] ss:$0 sm:$0xff] }
 0x348   :  { %v654_v3 = vpack.c.bf16 %v650_v2, %v650_v2 }
 0x34a   :  { %656 = vrot.lane.b32.xlu1 %v654_v3, %s1280_s26  ;;  %s992_s26 = sshll.u32 %s1589_s17, 4  ;;  %s993_s26 = int_to_ptr.hbm [resolvable:$true] %s992_s26 }
 0x34c   :  { %v590_v6 = vpop.f32.mrf.mxu2 }
 0x34f   :  { %470 = vrot.lane.b32.xlu0 %v468_v7, %s1281_s27  ;;  %v652_v8 = vpop.f32.mrf.mxu0  ;;  %v1122_v7 = vld [vmem:[%s1582_s10] ss:$0 sm:$0xff] }
 0x375   :  { %v712_v9 = vpop.f32.mrf.mxu2 }
 0x376   :  { %v716_v10 = vpack.c.bf16 %v712_v9, %v712_v9 }
 0x378   :  { %718 = vrot.lane.b32.xlu1 %v716_v10, %s1281_s27 }
 0x37a   :  { %v345_v11 = vpop.permute.xlu2 %344 }
 0x37b   :  { %348 = vst.msk [vmem:[#allocation2] sm:$0xf] %vm347_vm4, %v345_v11 }
 0x37d   :  { %v714_v12 = vpop.f32.mrf.mxu2 }
 0x392   :  { %v408_v13 = vpop.permute.xlu0 %407 }
 0x393   :  { %411 = vst.msk [vmem:[#allocation2] sm:$0xf] %vm410_vm5, %v408_v13 }
 0x3b9   :  { %v595_v14 = vpop.permute.xlu0 %594 }
 0x3ba   :  { %597 = vst.msk [vmem:[#allocation2 + $0x4] sm:$0xf] %vm347_vm4, %v595_v14  ;;  %v1102_v14 = vld [vmem:[%s1585_s13 + $0x18] sm:$0xff] }
 0x3bb   :  { %916 = vmatpush.bf16.msrb.mxu1 %v1102_v14 }
 0x3bc   :  { %v657_v15 = vpop.permute.xlu1 %656 }
 0x3bd   :  { %659 = vst.msk [vmem:[#allocation2 + $0x4] sm:$0xf] %vm410_vm5, %v657_v15  ;;  %v1101_v15 = vld [vmem:[%s1585_s13 + $0x10] sm:$0xff] }
 0x3bf   :  { %917 = vmatpush.bf16.msrb.mxu1 %v1101_v15 }
 0x3c1   :  { %v471_v16 = vpop.permute.xlu0 %470 }
 0x3c2   :  { %474 = vst.msk [vmem:[#allocation2] sm:$0xf] %vm473_vm6, %v471_v16  ;;  %v1100_v16 = vld [vmem:[%s1585_s13 + $0x8] sm:$0xff] }
 0x3c3   :  { %918 = vmatpush.bf16.msrb.mxu1 %v1100_v16 }
 0x3c7   :  { %919 = vmatpush.bf16.msrb.mxu1 %v1099_v17 }
 0x3ea   :  { %v719_v19 = vpop.permute.xlu1 %718 }
 0x3eb   :  { %721 = vst.msk [vmem:[#allocation2 + $0x4] sm:$0xf] %vm473_vm6, %v719_v19  ;;  %v1123_v19 = vld [vmem:[%s1584_s12] ss:$0 sm:$0xff] }
 0x3f2   :  { %v1094_v20 = vld [vmem:[#allocation2] sm:$0xff] }
 0x3f3   :  { %1061 = vmatmul.msk.bf16.vlgmr.msra.gmra.mxu3 %vm128_vm0, %v1094_v20 }
 0x476   :  { %v761_v22 = vpop.f32.mrf.mxu3 }
 0x477   :  { %v762_v23 = vadd.f32 %v1120_v21, %v761_v22 }
 0x479   :  { %v766_v24 = vadd.f32 %v762_v23, %v1399_v4 }
 0x47b   :  { %v770_v25 = vsel %vm128_vm0, %v766_v24, 0.0 }
 0x47c   :  { %771 = vadd.xlane.f32.xlu2 %v770_v25 }
 0x47e   :  { %v763_v26 = vpop.f32.mrf.mxu3 }
 0x47f   :  { %v764_v27 = vadd.f32 %v1120_v21, %v763_v26  ;;  %v1124_v26 = vld [vmem:[%s1586_s14] ss:$0 sm:$0xff] }
 0x481   :  { %v767_v28 = vadd.f32 %v764_v27, %v1404_v5 }
 0x483   :  { %v773_v29 = vsel %vm128_vm0, %v767_v28, 0.0 }
 0x484   :  { %774 = vadd.xlane.f32.xlu0 %v773_v29 }
 0x4ef   :  { %v772_v4 = vpop.xlane.xlu2 %771 }
 0x4f0   :  { %v783_v37 = vmul.f32 %v1519_v36, %v772_v4 }
 0x4f2   :  { %v785_v38 = vsub.f32 %v766_v24, %v783_v37 }
 0x4f4   :  { %v787_v39 = vmul.f32 %v785_v38, %v785_v38 }
 0x4f6   :  { %v789_v5 = vsel %vm128_vm0, %v787_v39, 0.0 }
 0x4f7   :  { %v775_v40 = vpop.xlane.xlu0 %774  ;;  %790 = vadd.xlane.f32.xlu1 %v789_v5 }
 0x4f8   :  { %v784_v41 = vmul.f32 %v1519_v36, %v775_v40 }
 0x4fa   :  { %v786_v42 = vsub.f32 %v767_v28, %v784_v41 }
 0x4fc   :  { %v788_v43 = vmul.f32 %v786_v42, %v786_v42 }
 0x4fe   :  { %v792_v44 = vsel %vm128_vm0, %v788_v43, 0.0 }
 0x4ff   :  { %793 = vadd.xlane.f32.xlu2 %v792_v44 }
 0x56a   :  { %v791_v46 = vpop.xlane.xlu1 %790 }
 0x56b   :  { %v795_v47 = vmul.f32 %v791_v46, %v1519_v36 }
 0x56d   :  { %v797_v49 = vadd.f32 1e-06, %v795_v47 }
 0x56f   :  { %1161 = vrsqrt.f32 %v797_v49  ;;  %vm805_vm9 = vweird.f32 %v797_v49 }
 0x572   :  { %v794_v50 = vpop.xlane.xlu2 %793 }
 0x573   :  { %v796_v51 = vmul.f32 %v794_v50, %v1519_v36 }
 0x575   :  { %v1162_v52 = vpop.eup %1161  ;;  %v798_v53 = vadd.f32 1e-06, %v796_v51 }
 0x576   :  { %v800_v54 = vmul.f32 %v1162_v52, %v797_v49  ;;  %vm806_vm8 = vweird.f32 %v1162_v52 }
 0x577   :  { %1163 = vrsqrt.f32 %v798_v53  ;;  %vm807_vm10 = vmor %vm805_vm9, %vm806_vm8  ;;  %vm815_vm12 = vweird.f32 %v798_v53 }
 0x578   :  { %v801_v55 = vmul.f32 %v1162_v52, %v800_v54 }
 0x57a   :  { %v802_v56 = vmul.f32 0.5, %v801_v55 }
 0x57c   :  { %v803_v57 = vsub.f32 1.5, %v802_v56 }
 0x57d   :  { %v1164_v58 = vpop.eup %1163 }
 0x57e   :  { %v804_v59 = vmul.f32 %v1162_v52, %v803_v57  ;;  %v810_v60 = vmul.f32 %v1164_v58, %v798_v53  ;;  %vm816_vm11 = vweird.f32 %v1164_v58 }
 0x57f   :  { %vm817_vm13 = vmor %vm815_vm12, %vm816_vm11 }
 0x580   :  { %v811_v61 = vmul.f32 %v1164_v58, %v810_v60  ;;  %v808_v62 = vsel %vm807_vm10, %v1162_v52, %v804_v59 }
 0x581   :  { %v819_v2 = vmul.f32 %v808_v62, %v785_v38 }
 0x582   :  { %v812_v63 = vmul.f32 0.5, %v811_v61 }
 0x583   :  { %v824_v8 = vmul.f32 %v1121_v1, %v819_v2 }
 0x584   :  { %v813_v0 = vsub.f32 1.5, %v812_v63 }
 0x585   :  { %v829_v11 = vadd.f32 %v1122_v7, %v824_v8 }
 0x586   :  { %v814_v3 = vmul.f32 %v1164_v58, %v813_v0 }
 0x588   :  { %v818_v6 = vsel %vm817_vm13, %v1164_v58, %v814_v3  ;;  %v1125_v58 = vld [vmem:[%s1587_s15] ss:$0 sm:$0xff]  ;;  %s1283_s15 = smov [#allocation9]  }
 0x589   :  { %v820_v9 = vmul.f32 %v818_v6, %v786_v42  ;;  %s990_s24 = sshll.u32 %s1283_s15, 4  ;;  %s991_s24 = int_to_ptr.vmem [resolvable:$true] %s990_s24 }
 0x58b   :  { %v825_v10 = vmul.f32 %v1121_v1, %v820_v9 }
 0x58d   :  { %v830_v12 = vadd.f32 %v1122_v7, %v825_v10 }
 0x58f   :  { %v831_v13 = vpack.c.bf16 %v830_v12, %v829_v11 }
 0x591   :  { %1070 = vmatmul.msk.bf16.vlgmr.msrb.gmra.mxu0 %vm128_vm0, %v831_v13 }
 0x60e   :  { %v864_v18 = vpop.f32.mrf.mxu0 }
 0x60f   :  { %v865_v20 = vadd.f32 %v1123_v19, %v864_v18 }
 0x611   :  { %v869_v23 = vmax.f32 %v865_v20, 0.0 }
 0x616   :  { %v866_v21 = vpop.f32.mrf.mxu0 }
 0x617   :  { %v867_v22 = vadd.f32 %v1123_v19, %v866_v21 }
 0x619   :  { %v870_v24 = vmax.f32 %v867_v22, 0.0 }
 0x61b   :  { %v871_v25 = vpack.c.bf16 %v870_v24, %v869_v23 }
 0x61d   :  { %1087 = vmatmul.msk.bf16.vlgmr.msrb.gmra.mxu1 %vm908_vm14, %v871_v25 }
 0x69a   :  { %v921_v27 = vpop.f32.mrf.mxu1 }
 0x69b   :  { %v922_v28 = vadd.f32 %v1124_v26, %v921_v27 }
 0x69d   :  { %v926_v29 = vadd.f32 %v922_v28, %v829_v11 }
 0x69f   :  { %v930_v30 = vsel %vm128_vm0, %v926_v29, 0.0 }
 0x6a0   :  { %931 = vadd.xlane.f32.xlu0 %v930_v30 }
 0x6a2   :  { %v923_v31 = vpop.f32.mrf.mxu1 }
 0x6a3   :  { %v924_v32 = vadd.f32 %v1124_v26, %v923_v31 }
 0x6a5   :  { %v927_v33 = vadd.f32 %v924_v32, %v830_v12 }
 0x6a7   :  { %v933_v34 = vsel %vm128_vm0, %v927_v33, 0.0 }
 0x6a8   :  { %934 = vadd.xlane.f32.xlu1 %v933_v34 }
 0x713   :  { %v932_v35 = vpop.xlane.xlu0 %931 }
 0x714   :  { %v936_v4 = vmul.f32 %v932_v35, %v1519_v36 }
 0x716   :  { %v938_v37 = vsub.f32 %v926_v29, %v936_v4 }
 0x718   :  { %v940_v38 = vmul.f32 %v938_v37, %v938_v37 }
 0x71a   :  { %v942_v39 = vsel %vm128_vm0, %v940_v38, 0.0 }
 0x71b   :  { %v935_v5 = vpop.xlane.xlu1 %934  ;;  %943 = vadd.xlane.f32.xlu2 %v942_v39 }
 0x71c   :  { %v937_v40 = vmul.f32 %v935_v5, %v1519_v36 }
 0x71e   :  { %v939_v41 = vsub.f32 %v927_v33, %v937_v40 }
 0x720   :  { %v941_v42 = vmul.f32 %v939_v41, %v939_v41 }
 0x722   :  { %v945_v43 = vsel %vm128_vm0, %v941_v42, 0.0 }
 0x723   :  { %946 = vadd.xlane.f32.xlu0 %v945_v43 }
 0x78e   :  { %v944_v44 = vpop.xlane.xlu2 %943 }
 0x78f   :  { %v948_v45 = vmul.f32 %v944_v44, %v1519_v36 }
 0x791   :  { %v950_v46 = vadd.f32 1e-06, %v948_v45 }
 0x793   :  { %1165 = vrsqrt.f32 %v950_v46  ;;  %vm958_vm1 = vweird.f32 %v950_v46 }
 0x796   :  { %v947_v47 = vpop.xlane.xlu0 %946 }
 0x797   :  { %v949_v48 = vmul.f32 %v947_v47, %v1519_v36  ;;  %v1126_v36 = vld [vmem:[%s1588_s16] ss:$0 sm:$0xff]  ;;  %s1284_s16 = smov 128  }
 0x799   :  { %v1166_v49 = vpop.eup %1165  ;;  %v951_v50 = vadd.f32 1e-06, %v949_v48 }
 0x79a   :  { %v953_v51 = vmul.f32 %v1166_v49, %v950_v46  ;;  %vm959_vm15 = vweird.f32 %v1166_v49 }
 0x79b   :  { %1167 = vrsqrt.f32 %v951_v50  ;;  %vm960_vm2 = vmor %vm958_vm1, %vm959_vm15  ;;  %vm968_vm4 = vweird.f32 %v951_v50 }
 0x79c   :  { %v954_v52 = vmul.f32 %v1166_v49, %v953_v51 }
 0x79e   :  { %v955_v53 = vmul.f32 0.5, %v954_v52 }
 0x7a0   :  { %v956_v54 = vsub.f32 1.5, %v955_v53 }
 0x7a1   :  { %v1168_v55 = vpop.eup %1167 }
 0x7a2   :  { %v957_v56 = vmul.f32 %v1166_v49, %v956_v54  ;;  %v963_v57 = vmul.f32 %v1168_v55, %v951_v50  ;;  %vm969_vm3 = vweird.f32 %v1168_v55 }
 0x7a3   :  { %vm970_vm5 = vmor %vm968_vm4, %vm969_vm3 }
 0x7a4   :  { %v961_v59 = vsel %vm960_vm2, %v1166_v49, %v957_v56  ;;  %v964_v60 = vmul.f32 %v1168_v55, %v963_v57 }
 0x7a5   :  { %v972_v61 = vmul.f32 %v961_v59, %v938_v37 }
 0x7a6   :  { %v965_v62 = vmul.f32 0.5, %v964_v60 }
 0x7a7   :  { %v977_v63 = vmul.f32 %v1125_v58, %v972_v61 }
 0x7a8   :  { %v966_v0 = vsub.f32 1.5, %v965_v62 }
 0x7a9   :  { %v982_v1 = vadd.f32 %v1126_v36, %v977_v63 }
 0x7aa   :  { %v967_v2 = vmul.f32 %v1168_v55, %v966_v0 }
 0x7ab   :  { %984 = vst.msk [vmem:[#allocation9] sm:$0xff] %vm128_vm0, %v982_v1 }
 0x7ac   :  { %v971_v3 = vsel %vm970_vm5, %v1168_v55, %v967_v2 }
 0x7ad   :  { %v973_v6 = vmul.f32 %v971_v3, %v939_v41 }
 0x7af   :  { %v978_v7 = vmul.f32 %v1125_v58, %v973_v6 }
 0x7b1   :  { %v983_v8 = vadd.f32 %v1126_v36, %v978_v7 }
 0x7b3   :  { %985 = vst.msk [vmem:[#allocation9 + $0x8] sm:$0xff] %vm128_vm0, %v983_v8 }
 0x7b4   :  { %998 = dma.vmem_to_hbm [thread:$0]  %s991_s24, 256, %s993_s26, [#allocation5], %s1284_s16, %s1284_s16, %s1279_s6  }
 0x7b5   :  { %1269 = dma.done.wait [#allocation5], 256  }
 0x7b6   :  { %1270 = vsyncadd [#allocation5], 4294967040 }
 0x7b7   :  { %1003 = vsyncpa [#allocation4], 1 }
 0x7b8   :  { %1004 = vsyncpa [#allocation7], 1 }
 0x7b9   :  { %1005 = vsyncpa [#allocation5], 1 }

</bundles_post_ra>
